<compile_context>
chip_gen: v7x
topology: tpu7x:2x2x1
jax: 0.10.0
libtpu: 0.0.40
codegen_flags: <defaults>
</compile_context>

<pallas_src>
import functools

import jax
import jax.numpy as jnp
from jax.experimental import pallas as pl
from jax.experimental.pallas import tpu as pltpu

HEADS = 6          # GATConv heads
HID = 30           # GATConv out_channels (concat=False -> averaged over heads)
NEG_SLOPE = 0.2    # LeakyReLU slope in GAT attention
BN_EPS = 1e-5
BN_SCALE = 1.0 / (1.0 + BN_EPS) ** 0.5   # eval-mode BatchNorm with default stats
NEG_INF = -1e30


def net_el_kernel(x_dst_ref, x_src_ref, bias_ref, w_ref, asrc_ref, adst_ref,
                  gat_b_ref, lin_w_ref, lin_b_ref, out_ref):
    """One destination-row tile of fused GAT + BN + ReLU + Linear + ReLU."""
    x_d = x_dst_ref[...]            # [TM, 1]  features of dst nodes in this tile
    x_s = x_src_ref[...]            # [1, N]   features of all (source) nodes
    bias = bias_ref[...]            # [TM, N]  0 on edges / -1e30 on non-edges
    w = w_ref[...]                  # [HEADS, HID] per-head GAT weight rows

    # in_channels == 1 collapses attention coefficients to per-head scalars:
    #   xh_h[j, :] = x[j] * w_h  =>  <xh_h[j], a_*_h> = x[j] * <w_h, a_*_h>
    c_src = jnp.sum(w * asrc_ref[...], axis=-1, keepdims=True)    # [HEADS, 1]
    c_dst = jnp.sum(w * adst_ref[...], axis=-1, keepdims=True)    # [HEADS, 1]

    tm = x_d.shape[0]
    acc = jnp.zeros((tm, HID), dtype=jnp.float32)
    for h in range(HEADS):                                 # static unroll (6)
        e = x_d * c_dst[h:h + 1, :] + x_s * c_src[h:h + 1, :]      # [TM, N]
        e = jnp.maximum(e, NEG_SLOPE * e)                  # LeakyReLU(0.2)
        e = e + bias                                       # non-edges -> ~-1e30
        # Stable softmax over source nodes, fused with the aggregation:
        #   s_h[i] = sum_j softmax_j(e)[i, j] * x[j]
        m = jnp.max(e, axis=-1, keepdims=True)
        ex = jnp.exp(e - m)                                # masked entries -> 0
        den = jnp.sum(ex, axis=-1, keepdims=True)
        num = jnp.sum(ex * x_s, axis=-1, keepdims=True)
        s_h = num * pl.reciprocal(den, approx=True)        # [TM, 1]
        # head output is rank-1 (again because in_channels == 1)
        acc = acc + s_h * w[h:h + 1, :]                    # [TM, HID]

    # concat=False -> mean over heads + GAT bias; GNN.bn1 (eval, default stats)
    # then ReLU; Net_el.bn1 (same eval transform); Linear(30->1); ReLU.
    # 1/HEADS and the BN scales are folded into constants / the linear weight.
    pre = acc * (BN_SCALE / HEADS) + gat_b_ref[...] * BN_SCALE
    h1 = jnp.maximum(pre, 0.0)
    # TODO(synk): Net_el.bn1 is BatchNorm1d(64) but receives a 30-channel tensor
    # (shape bug in the reference); we apply the shape-agnostic eval-mode BN
    # transform with default stats, folded into the linear weight below.
    lw = lin_w_ref[...] * BN_SCALE                                  # [1, HID]
    y = jnp.sum(h1 * lw, axis=-1, keepdims=True) + lin_b_ref[...]   # [TM, 1]
    out_ref[...] = jnp.maximum(y, 0.0)


def edge_list_to_bias(el, n):
    """Additive attention bias: 0 for edges (dst<-src) and self-loops
    (PyG GATConv adds self loops), -1e30 elsewhere."""
    src, dst = el[0], el[1]
    adj = jnp.zeros((n, n), jnp.float32).at[dst, src].set(1.0)
    adj = jnp.maximum(adj, jnp.eye(n, dtype=jnp.float32))
    return jnp.where(adj > 0.0, 0.0, NEG_INF)


def init_params(key):
    k1, k2, k3, k4 = jax.random.split(key, 4)
    return {
        "w": jax.random.normal(k1, (HEADS, HID), jnp.float32) * 0.1,
        "a_src": jax.random.normal(k2, (HEADS, HID), jnp.float32) * 0.1,
        "a_dst": jax.random.normal(k3, (HEADS, HID), jnp.float32) * 0.1,
        "gat_b": jnp.zeros((1, HID), jnp.float32),
        "lin_w": jax.random.normal(k4, (1, HID), jnp.float32) * 0.1,
        "lin_b": jnp.zeros((1, 1), jnp.float32),
    }


def pick_tile_m(n, max_tile=256):
    """Largest dst-row tile <= max_tile that divides n and is a multiple of 8."""
    if n <= max_tile:
        return n
    t = (max_tile // 8) * 8
    while t > 8 and n % t != 0:
        t -= 8
    return t if n % t == 0 else n


@functools.partial(jax.jit, static_argnames=("tile_m",))
def net_el_forward(x, bias, params, *, tile_m):
    n = x.shape[0]
    assert n % tile_m == 0 and (tile_m % 8 == 0 or tile_m == n)
    x_row = x.reshape(1, n)   # source-node features, lane-major (layout plumbing)

    def full(shape):
        return pl.BlockSpec(shape, lambda i: (0, 0))

    return pl.pallas_call(
        net_el_kernel,
        out_shape=jax.ShapeDtypeStruct((n, 1), jnp.float32),
        grid=(n // tile_m,),
        in_specs=[
            pl.BlockSpec((tile_m, 1), lambda i: (i, 0)),   # x (dst-row tile)
            full((1, n)),                                  # x (all sources, row)
            pl.BlockSpec((tile_m, n), lambda i: (i, 0)),   # attention bias tile
            full((HEADS, HID)),                            # GAT weight
            full((HEADS, HID)),                            # a_src
            full((HEADS, HID)),                            # a_dst
            full((1, HID)),                                # GAT bias
            full((1, HID)),                                # lin1 weight (row)
            full((1, 1)),                                  # lin1 bias
        ],
        out_specs=pl.BlockSpec((tile_m, 1), lambda i: (i, 0)),
        compiler_params=pltpu.CompilerParams(
            dimension_semantics=("parallel",),             # shard row tiles (v7x 2 TCs)
            vmem_limit_bytes=48 * 1024 * 1024,             # safe on v5e/v6e/v7x
        ),
    )(x, x_row, bias, params["w"], params["a_src"], params["a_dst"],
      params["gat_b"], params["lin_w"], params["lin_b"])


if __name__ == "__main__":
    key = jax.random.PRNGKey(0)
    kx, ke, kp = jax.random.split(key, 3)

    N, E = 128, 512
    x = jax.random.normal(kx, (N, 1), jnp.float32)         # node features [N, 1]
    el = jax.random.randint(ke, (2, E), 0, N)              # edge list [2, E]

    bias = edge_list_to_bias(el, N)
    params = init_params(kp)

    tile_m = pick_tile_m(N, max_tile=64)                   # -> 64, grid=(2,)
    out = net_el_forward(x, bias, params, tile_m=tile_m)
    jax.block_until_ready(out)
    assert out.shape == (N, 1) and out.dtype == jnp.float32
    assert bool(jnp.all(jnp.isfinite(out)))
    print("KERNEL_OK")
</pallas_src>

<mosaic_0001>
module attributes {stable_mosaic.version = 11 : i64} {
  func.func @net_el_kernel(%arg0: i32, %arg1: memref<64x1xf32, #tpu.memory_space<vmem>>, %arg2: memref<1x128xf32, #tpu.memory_space<vmem>>, %arg3: memref<64x128xf32, #tpu.memory_space<vmem>>, %arg4: memref<6x30xf32, #tpu.memory_space<vmem>>, %arg5: memref<6x30xf32, #tpu.memory_space<vmem>>, %arg6: memref<6x30xf32, #tpu.memory_space<vmem>>, %arg7: memref<1x30xf32, #tpu.memory_space<vmem>>, %arg8: memref<1x30xf32, #tpu.memory_space<vmem>>, %arg9: memref<1x1xf32, #tpu.memory_space<vmem>>, %arg10: memref<64x1xf32, #tpu.memory_space<vmem>>) attributes {dimension_semantics = [#tpu.dimension_semantics<parallel>], iteration_bounds = array<i64: 2>, scalar_prefetch = 0 : i64, scratch_operands = 0 : i64, tpu.core_type = #tpu.core_type<tc>, window_params = [{transform_indices = @transform_0, window_bounds = array<i64: 64, 1>}, {pipeline_mode = #tpu.pipeline_mode<synchronous>, transform_indices = @transform_1, window_bounds = array<i64: 1, 128>}, {transform_indices = @transform_2, window_bounds = array<i64: 64, 128>}, {pipeline_mode = #tpu.pipeline_mode<synchronous>, transform_indices = @transform_3, window_bounds = array<i64: 6, 30>}, {pipeline_mode = #tpu.pipeline_mode<synchronous>, transform_indices = @transform_4, window_bounds = array<i64: 6, 30>}, {pipeline_mode = #tpu.pipeline_mode<synchronous>, transform_indices = @transform_5, window_bounds = array<i64: 6, 30>}, {pipeline_mode = #tpu.pipeline_mode<synchronous>, transform_indices = @transform_6, window_bounds = array<i64: 1, 30>}, {pipeline_mode = #tpu.pipeline_mode<synchronous>, transform_indices = @transform_7, window_bounds = array<i64: 1, 30>}, {pipeline_mode = #tpu.pipeline_mode<synchronous>, transform_indices = @transform_8, window_bounds = array<i64: 1, 1>}, {transform_indices = @transform_9, window_bounds = array<i64: 64, 1>}]} {
    %c0 = arith.constant 0 : index
    %c0_0 = arith.constant 0 : index
    %0 = vector.load %arg1[%c0, %c0_0] : memref<64x1xf32, #tpu.memory_space<vmem>>, vector<64x1xf32>
    %c0_1 = arith.constant 0 : index
    %c0_2 = arith.constant 0 : index
    %1 = vector.load %arg2[%c0_1, %c0_2] : memref<1x128xf32, #tpu.memory_space<vmem>>, vector<1x128xf32>
    %c0_3 = arith.constant 0 : index
    %c0_4 = arith.constant 0 : index
    %2 = vector.load %arg3[%c0_3, %c0_4] : memref<64x128xf32, #tpu.memory_space<vmem>>, vector<64x128xf32>
    %c0_5 = arith.constant 0 : index
    %c0_6 = arith.constant 0 : index
    %3 = vector.load %arg4[%c0_5, %c0_6] : memref<6x30xf32, #tpu.memory_space<vmem>>, vector<6x30xf32>
    %c0_7 = arith.constant 0 : index
    %c0_8 = arith.constant 0 : index
    %4 = vector.load %arg5[%c0_7, %c0_8] : memref<6x30xf32, #tpu.memory_space<vmem>>, vector<6x30xf32>
    %5 = arith.mulf %3, %4 : vector<6x30xf32>
    %cst = arith.constant dense<0.000000e+00> : vector<6xf32>
    %6 = vector.multi_reduction <add>, %5, %cst [1] : vector<6x30xf32> to vector<6xf32>
    %7 = vector.shape_cast %6 : vector<6xf32> to vector<6x1xf32>
    %c0_9 = arith.constant 0 : index
    %c0_10 = arith.constant 0 : index
    %8 = vector.load %arg6[%c0_9, %c0_10] : memref<6x30xf32, #tpu.memory_space<vmem>>, vector<6x30xf32>
    %9 = arith.mulf %3, %8 : vector<6x30xf32>
    %cst_11 = arith.constant dense<0.000000e+00> : vector<6xf32>
    %10 = vector.multi_reduction <add>, %9, %cst_11 [1] : vector<6x30xf32> to vector<6xf32>
    %11 = vector.shape_cast %10 : vector<6xf32> to vector<6x1xf32>
    %cst_12 = arith.constant 0.000000e+00 : f32
    %12 = vector.broadcast %cst_12 : f32 to vector<64x30xf32>
    %13 = vector.extract_strided_slice %11 {offsets = [0, 0], sizes = [1, 1], strides = [1, 1]} : vector<6x1xf32> to vector<1x1xf32>
    %14 = vector.broadcast %13 : vector<1x1xf32> to vector<64x1xf32>
    %15 = arith.mulf %0, %14 : vector<64x1xf32>
    %16 = vector.extract_strided_slice %7 {offsets = [0, 0], sizes = [1, 1], strides = [1, 1]} : vector<6x1xf32> to vector<1x1xf32>
    %17 = vector.broadcast %16 : vector<1x1xf32> to vector<1x128xf32>
    %18 = arith.mulf %1, %17 : vector<1x128xf32>
    %19 = vector.broadcast %15 : vector<64x1xf32> to vector<64x128xf32>
    %20 = vector.broadcast %18 : vector<1x128xf32> to vector<64x128xf32>
    %21 = arith.addf %19, %20 : vector<64x128xf32>
    %cst_13 = arith.constant 2.000000e-01 : f32
    %22 = vector.broadcast %cst_13 : f32 to vector<64x128xf32>
    %23 = arith.mulf %22, %21 : vector<64x128xf32>
    %24 = arith.maximumf %21, %23 : vector<64x128xf32>
    %25 = arith.addf %24, %2 : vector<64x128xf32>
    %cst_14 = arith.constant dense<0xFF800000> : vector<64xf32>
    %26 = vector.multi_reduction <maximumf>, %25, %cst_14 [1] : vector<64x128xf32> to vector<64xf32>
    %27 = vector.shape_cast %26 : vector<64xf32> to vector<64x1xf32>
    %28 = vector.broadcast %27 : vector<64x1xf32> to vector<64x128xf32>
    %29 = arith.subf %25, %28 : vector<64x128xf32>
    %30 = math.exp %29 : vector<64x128xf32>
    %cst_15 = arith.constant dense<0.000000e+00> : vector<64xf32>
    %31 = vector.multi_reduction <add>, %30, %cst_15 [1] : vector<64x128xf32> to vector<64xf32>
    %32 = vector.shape_cast %31 : vector<64xf32> to vector<64x1xf32>
    %33 = vector.broadcast %1 : vector<1x128xf32> to vector<64x128xf32>
    %34 = arith.mulf %30, %33 : vector<64x128xf32>
    %cst_16 = arith.constant dense<0.000000e+00> : vector<64xf32>
    %35 = vector.multi_reduction <add>, %34, %cst_16 [1] : vector<64x128xf32> to vector<64xf32>
    %36 = vector.shape_cast %35 : vector<64xf32> to vector<64x1xf32>
    %37 = tpu.reciprocal %32 {approx = true} : vector<64x1xf32> -> vector<64x1xf32>
    %38 = arith.mulf %36, %37 : vector<64x1xf32>
    %39 = vector.extract_strided_slice %3 {offsets = [0, 0], sizes = [1, 30], strides = [1, 1]} : vector<6x30xf32> to vector<1x30xf32>
    %40 = vector.broadcast %38 : vector<64x1xf32> to vector<64x30xf32>
    %41 = vector.broadcast %39 : vector<1x30xf32> to vector<64x30xf32>
    %42 = arith.mulf %40, %41 : vector<64x30xf32>
    %43 = arith.addf %12, %42 : vector<64x30xf32>
    %44 = vector.extract_strided_slice %11 {offsets = [1, 0], sizes = [1, 1], strides = [1, 1]} : vector<6x1xf32> to vector<1x1xf32>
    %45 = vector.broadcast %44 : vector<1x1xf32> to vector<64x1xf32>
    %46 = arith.mulf %0, %45 : vector<64x1xf32>
    %47 = vector.extract_strided_slice %7 {offsets = [1, 0], sizes = [1, 1], strides = [1, 1]} : vector<6x1xf32> to vector<1x1xf32>
    %48 = vector.broadcast %47 : vector<1x1xf32> to vector<1x128xf32>
    %49 = arith.mulf %1, %48 : vector<1x128xf32>
    %50 = vector.broadcast %46 : vector<64x1xf32> to vector<64x128xf32>
    %51 = vector.broadcast %49 : vector<1x128xf32> to vector<64x128xf32>
    %52 = arith.addf %50, %51 : vector<64x128xf32>
    %cst_17 = arith.constant 2.000000e-01 : f32
    %53 = vector.broadcast %cst_17 : f32 to vector<64x128xf32>
    %54 = arith.mulf %53, %52 : vector<64x128xf32>
    %55 = arith.maximumf %52, %54 : vector<64x128xf32>
    %56 = arith.addf %55, %2 : vector<64x128xf32>
    %cst_18 = arith.constant dense<0xFF800000> : vector<64xf32>
    %57 = vector.multi_reduction <maximumf>, %56, %cst_18 [1] : vector<64x128xf32> to vector<64xf32>
    %58 = vector.shape_cast %57 : vector<64xf32> to vector<64x1xf32>
    %59 = vector.broadcast %58 : vector<64x1xf32> to vector<64x128xf32>
    %60 = arith.subf %56, %59 : vector<64x128xf32>
    %61 = math.exp %60 : vector<64x128xf32>
    %cst_19 = arith.constant dense<0.000000e+00> : vector<64xf32>
    %62 = vector.multi_reduction <add>, %61, %cst_19 [1] : vector<64x128xf32> to vector<64xf32>
    %63 = vector.shape_cast %62 : vector<64xf32> to vector<64x1xf32>
    %64 = vector.broadcast %1 : vector<1x128xf32> to vector<64x128xf32>
    %65 = arith.mulf %61, %64 : vector<64x128xf32>
    %cst_20 = arith.constant dense<0.000000e+00> : vector<64xf32>
    %66 = vector.multi_reduction <add>, %65, %cst_20 [1] : vector<64x128xf32> to vector<64xf32>
    %67 = vector.shape_cast %66 : vector<64xf32> to vector<64x1xf32>
    %68 = tpu.reciprocal %63 {approx = true} : vector<64x1xf32> -> vector<64x1xf32>
    %69 = arith.mulf %67, %68 : vector<64x1xf32>
    %70 = vector.extract_strided_slice %3 {offsets = [1, 0], sizes = [1, 30], strides = [1, 1]} : vector<6x30xf32> to vector<1x30xf32>
    %71 = vector.broadcast %69 : vector<64x1xf32> to vector<64x30xf32>
    %72 = vector.broadcast %70 : vector<1x30xf32> to vector<64x30xf32>
    %73 = arith.mulf %71, %72 : vector<64x30xf32>
    %74 = arith.addf %43, %73 : vector<64x30xf32>
    %75 = vector.extract_strided_slice %11 {offsets = [2, 0], sizes = [1, 1], strides = [1, 1]} : vector<6x1xf32> to vector<1x1xf32>
    %76 = vector.broadcast %75 : vector<1x1xf32> to vector<64x1xf32>
    %77 = arith.mulf %0, %76 : vector<64x1xf32>
    %78 = vector.extract_strided_slice %7 {offsets = [2, 0], sizes = [1, 1], strides = [1, 1]} : vector<6x1xf32> to vector<1x1xf32>
    %79 = vector.broadcast %78 : vector<1x1xf32> to vector<1x128xf32>
    %80 = arith.mulf %1, %79 : vector<1x128xf32>
    %81 = vector.broadcast %77 : vector<64x1xf32> to vector<64x128xf32>
    %82 = vector.broadcast %80 : vector<1x128xf32> to vector<64x128xf32>
    %83 = arith.addf %81, %82 : vector<64x128xf32>
    %cst_21 = arith.constant 2.000000e-01 : f32
    %84 = vector.broadcast %cst_21 : f32 to vector<64x128xf32>
    %85 = arith.mulf %84, %83 : vector<64x128xf32>
    %86 = arith.maximumf %83, %85 : vector<64x128xf32>
    %87 = arith.addf %86, %2 : vector<64x128xf32>
    %cst_22 = arith.constant dense<0xFF800000> : vector<64xf32>
    %88 = vector.multi_reduction <maximumf>, %87, %cst_22 [1] : vector<64x128xf32> to vector<64xf32>
    %89 = vector.shape_cast %88 : vector<64xf32> to vector<64x1xf32>
    %90 = vector.broadcast %89 : vector<64x1xf32> to vector<64x128xf32>
    %91 = arith.subf %87, %90 : vector<64x128xf32>
    %92 = math.exp %91 : vector<64x128xf32>
    %cst_23 = arith.constant dense<0.000000e+00> : vector<64xf32>
    %93 = vector.multi_reduction <add>, %92, %cst_23 [1] : vector<64x128xf32> to vector<64xf32>
    %94 = vector.shape_cast %93 : vector<64xf32> to vector<64x1xf32>
    %95 = vector.broadcast %1 : vector<1x128xf32> to vector<64x128xf32>
    %96 = arith.mulf %92, %95 : vector<64x128xf32>
    %cst_24 = arith.constant dense<0.000000e+00> : vector<64xf32>
    %97 = vector.multi_reduction <add>, %96, %cst_24 [1] : vector<64x128xf32> to vector<64xf32>
    %98 = vector.shape_cast %97 : vector<64xf32> to vector<64x1xf32>
    %99 = tpu.reciprocal %94 {approx = true} : vector<64x1xf32> -> vector<64x1xf32>
    %100 = arith.mulf %98, %99 : vector<64x1xf32>
    %101 = vector.extract_strided_slice %3 {offsets = [2, 0], sizes = [1, 30], strides = [1, 1]} : vector<6x30xf32> to vector<1x30xf32>
    %102 = vector.broadcast %100 : vector<64x1xf32> to vector<64x30xf32>
    %103 = vector.broadcast %101 : vector<1x30xf32> to vector<64x30xf32>
    %104 = arith.mulf %102, %103 : vector<64x30xf32>
    %105 = arith.addf %74, %104 : vector<64x30xf32>
    %106 = vector.extract_strided_slice %11 {offsets = [3, 0], sizes = [1, 1], strides = [1, 1]} : vector<6x1xf32> to vector<1x1xf32>
    %107 = vector.broadcast %106 : vector<1x1xf32> to vector<64x1xf32>
    %108 = arith.mulf %0, %107 : vector<64x1xf32>
    %109 = vector.extract_strided_slice %7 {offsets = [3, 0], sizes = [1, 1], strides = [1, 1]} : vector<6x1xf32> to vector<1x1xf32>
    %110 = vector.broadcast %109 : vector<1x1xf32> to vector<1x128xf32>
    %111 = arith.mulf %1, %110 : vector<1x128xf32>
    %112 = vector.broadcast %108 : vector<64x1xf32> to vector<64x128xf32>
    %113 = vector.broadcast %111 : vector<1x128xf32> to vector<64x128xf32>
    %114 = arith.addf %112, %113 : vector<64x128xf32>
    %cst_25 = arith.constant 2.000000e-01 : f32
    %115 = vector.broadcast %cst_25 : f32 to vector<64x128xf32>
    %116 = arith.mulf %115, %114 : vector<64x128xf32>
    %117 = arith.maximumf %114, %116 : vector<64x128xf32>
    %118 = arith.addf %117, %2 : vector<64x128xf32>
    %cst_26 = arith.constant dense<0xFF800000> : vector<64xf32>
    %119 = vector.multi_reduction <maximumf>, %118, %cst_26 [1] : vector<64x128xf32> to vector<64xf32>
    %120 = vector.shape_cast %119 : vector<64xf32> to vector<64x1xf32>
    %121 = vector.broadcast %120 : vector<64x1xf32> to vector<64x128xf32>
    %122 = arith.subf %118, %121 : vector<64x128xf32>
    %123 = math.exp %122 : vector<64x128xf32>
    %cst_27 = arith.constant dense<0.000000e+00> : vector<64xf32>
    %124 = vector.multi_reduction <add>, %123, %cst_27 [1] : vector<64x128xf32> to vector<64xf32>
    %125 = vector.shape_cast %124 : vector<64xf32> to vector<64x1xf32>
    %126 = vector.broadcast %1 : vector<1x128xf32> to vector<64x128xf32>
    %127 = arith.mulf %123, %126 : vector<64x128xf32>
    %cst_28 = arith.constant dense<0.000000e+00> : vector<64xf32>
    %128 = vector.multi_reduction <add>, %127, %cst_28 [1] : vector<64x128xf32> to vector<64xf32>
    %129 = vector.shape_cast %128 : vector<64xf32> to vector<64x1xf32>
    %130 = tpu.reciprocal %125 {approx = true} : vector<64x1xf32> -> vector<64x1xf32>
    %131 = arith.mulf %129, %130 : vector<64x1xf32>
    %132 = vector.extract_strided_slice %3 {offsets = [3, 0], sizes = [1, 30], strides = [1, 1]} : vector<6x30xf32> to vector<1x30xf32>
    %133 = vector.broadcast %131 : vector<64x1xf32> to vector<64x30xf32>
    %134 = vector.broadcast %132 : vector<1x30xf32> to vector<64x30xf32>
    %135 = arith.mulf %133, %134 : vector<64x30xf32>
    %136 = arith.addf %105, %135 : vector<64x30xf32>
    %137 = vector.extract_strided_slice %11 {offsets = [4, 0], sizes = [1, 1], strides = [1, 1]} : vector<6x1xf32> to vector<1x1xf32>
    %138 = vector.broadcast %137 : vector<1x1xf32> to vector<64x1xf32>
    %139 = arith.mulf %0, %138 : vector<64x1xf32>
    %140 = vector.extract_strided_slice %7 {offsets = [4, 0], sizes = [1, 1], strides = [1, 1]} : vector<6x1xf32> to vector<1x1xf32>
    %141 = vector.broadcast %140 : vector<1x1xf32> to vector<1x128xf32>
    %142 = arith.mulf %1, %141 : vector<1x128xf32>
    %143 = vector.broadcast %139 : vector<64x1xf32> to vector<64x128xf32>
    %144 = vector.broadcast %142 : vector<1x128xf32> to vector<64x128xf32>
    %145 = arith.addf %143, %144 : vector<64x128xf32>
    %cst_29 = arith.constant 2.000000e-01 : f32
    %146 = vector.broadcast %cst_29 : f32 to vector<64x128xf32>
    %147 = arith.mulf %146, %145 : vector<64x128xf32>
    %148 = arith.maximumf %145, %147 : vector<64x128xf32>
    %149 = arith.addf %148, %2 : vector<64x128xf32>
    %cst_30 = arith.constant dense<0xFF800000> : vector<64xf32>
    %150 = vector.multi_reduction <maximumf>, %149, %cst_30 [1] : vector<64x128xf32> to vector<64xf32>
    %151 = vector.shape_cast %150 : vector<64xf32> to vector<64x1xf32>
    %152 = vector.broadcast %151 : vector<64x1xf32> to vector<64x128xf32>
    %153 = arith.subf %149, %152 : vector<64x128xf32>
    %154 = math.exp %153 : vector<64x128xf32>
    %cst_31 = arith.constant dense<0.000000e+00> : vector<64xf32>
    %155 = vector.multi_reduction <add>, %154, %cst_31 [1] : vector<64x128xf32> to vector<64xf32>
    %156 = vector.shape_cast %155 : vector<64xf32> to vector<64x1xf32>
    %157 = vector.broadcast %1 : vector<1x128xf32> to vector<64x128xf32>
    %158 = arith.mulf %154, %157 : vector<64x128xf32>
    %cst_32 = arith.constant dense<0.000000e+00> : vector<64xf32>
    %159 = vector.multi_reduction <add>, %158, %cst_32 [1] : vector<64x128xf32> to vector<64xf32>
    %160 = vector.shape_cast %159 : vector<64xf32> to vector<64x1xf32>
    %161 = tpu.reciprocal %156 {approx = true} : vector<64x1xf32> -> vector<64x1xf32>
    %162 = arith.mulf %160, %161 : vector<64x1xf32>
    %163 = vector.extract_strided_slice %3 {offsets = [4, 0], sizes = [1, 30], strides = [1, 1]} : vector<6x30xf32> to vector<1x30xf32>
    %164 = vector.broadcast %162 : vector<64x1xf32> to vector<64x30xf32>
    %165 = vector.broadcast %163 : vector<1x30xf32> to vector<64x30xf32>
    %166 = arith.mulf %164, %165 : vector<64x30xf32>
    %167 = arith.addf %136, %166 : vector<64x30xf32>
    %168 = vector.extract_strided_slice %11 {offsets = [5, 0], sizes = [1, 1], strides = [1, 1]} : vector<6x1xf32> to vector<1x1xf32>
    %169 = vector.broadcast %168 : vector<1x1xf32> to vector<64x1xf32>
    %170 = arith.mulf %0, %169 : vector<64x1xf32>
    %171 = vector.extract_strided_slice %7 {offsets = [5, 0], sizes = [1, 1], strides = [1, 1]} : vector<6x1xf32> to vector<1x1xf32>
    %172 = vector.broadcast %171 : vector<1x1xf32> to vector<1x128xf32>
    %173 = arith.mulf %1, %172 : vector<1x128xf32>
    %174 = vector.broadcast %170 : vector<64x1xf32> to vector<64x128xf32>
    %175 = vector.broadcast %173 : vector<1x128xf32> to vector<64x128xf32>
    %176 = arith.addf %174, %175 : vector<64x128xf32>
    %cst_33 = arith.constant 2.000000e-01 : f32
    %177 = vector.broadcast %cst_33 : f32 to vector<64x128xf32>
    %178 = arith.mulf %177, %176 : vector<64x128xf32>
    %179 = arith.maximumf %176, %178 : vector<64x128xf32>
    %180 = arith.addf %179, %2 : vector<64x128xf32>
    %cst_34 = arith.constant dense<0xFF800000> : vector<64xf32>
    %181 = vector.multi_reduction <maximumf>, %180, %cst_34 [1] : vector<64x128xf32> to vector<64xf32>
    %182 = vector.shape_cast %181 : vector<64xf32> to vector<64x1xf32>
    %183 = vector.broadcast %182 : vector<64x1xf32> to vector<64x128xf32>
    %184 = arith.subf %180, %183 : vector<64x128xf32>
    %185 = math.exp %184 : vector<64x128xf32>
    %cst_35 = arith.constant dense<0.000000e+00> : vector<64xf32>
    %186 = vector.multi_reduction <add>, %185, %cst_35 [1] : vector<64x128xf32> to vector<64xf32>
    %187 = vector.shape_cast %186 : vector<64xf32> to vector<64x1xf32>
    %188 = vector.broadcast %1 : vector<1x128xf32> to vector<64x128xf32>
    %189 = arith.mulf %185, %188 : vector<64x128xf32>
    %cst_36 = arith.constant dense<0.000000e+00> : vector<64xf32>
    %190 = vector.multi_reduction <add>, %189, %cst_36 [1] : vector<64x128xf32> to vector<64xf32>
    %191 = vector.shape_cast %190 : vector<64xf32> to vector<64x1xf32>
    %192 = tpu.reciprocal %187 {approx = true} : vector<64x1xf32> -> vector<64x1xf32>
    %193 = arith.mulf %191, %192 : vector<64x1xf32>
    %194 = vector.extract_strided_slice %3 {offsets = [5, 0], sizes = [1, 30], strides = [1, 1]} : vector<6x30xf32> to vector<1x30xf32>
    %195 = vector.broadcast %193 : vector<64x1xf32> to vector<64x30xf32>
    %196 = vector.broadcast %194 : vector<1x30xf32> to vector<64x30xf32>
    %197 = arith.mulf %195, %196 : vector<64x30xf32>
    %198 = arith.addf %167, %197 : vector<64x30xf32>
    %cst_37 = arith.constant 0.166665837 : f32
    %199 = vector.broadcast %cst_37 : f32 to vector<64x30xf32>
    %200 = arith.mulf %198, %199 : vector<64x30xf32>
    %c0_38 = arith.constant 0 : index
    %c0_39 = arith.constant 0 : index
    %201 = vector.load %arg7[%c0_38, %c0_39] : memref<1x30xf32, #tpu.memory_space<vmem>>, vector<1x30xf32>
    %cst_40 = arith.constant 0.999994993 : f32
    %202 = vector.broadcast %cst_40 : f32 to vector<1x30xf32>
    %203 = arith.mulf %201, %202 : vector<1x30xf32>
    %204 = vector.broadcast %203 : vector<1x30xf32> to vector<64x30xf32>
    %205 = arith.addf %200, %204 : vector<64x30xf32>
    %cst_41 = arith.constant 0.000000e+00 : f32
    %206 = vector.broadcast %cst_41 : f32 to vector<64x30xf32>
    %207 = arith.maximumf %205, %206 : vector<64x30xf32>
    %c0_42 = arith.constant 0 : index
    %c0_43 = arith.constant 0 : index
    %208 = vector.load %arg8[%c0_42, %c0_43] : memref<1x30xf32, #tpu.memory_space<vmem>>, vector<1x30xf32>
    %cst_44 = arith.constant 0.999994993 : f32
    %209 = vector.broadcast %cst_44 : f32 to vector<1x30xf32>
    %210 = arith.mulf %208, %209 : vector<1x30xf32>
    %211 = vector.broadcast %210 : vector<1x30xf32> to vector<64x30xf32>
    %212 = arith.mulf %207, %211 : vector<64x30xf32>
    %cst_45 = arith.constant dense<0.000000e+00> : vector<64xf32>
    %213 = vector.multi_reduction <add>, %212, %cst_45 [1] : vector<64x30xf32> to vector<64xf32>
    %214 = vector.shape_cast %213 : vector<64xf32> to vector<64x1xf32>
    %c0_46 = arith.constant 0 : index
    %c0_47 = arith.constant 0 : index
    %215 = vector.load %arg9[%c0_46, %c0_47] : memref<1x1xf32, #tpu.memory_space<vmem>>, vector<1x1xf32>
    %216 = vector.broadcast %215 : vector<1x1xf32> to vector<64x1xf32>
    %217 = arith.addf %214, %216 : vector<64x1xf32>
    %cst_48 = arith.constant 0.000000e+00 : f32
    %218 = vector.broadcast %cst_48 : f32 to vector<64x1xf32>
    %219 = arith.maximumf %217, %218 : vector<64x1xf32>
    %c0_49 = arith.constant 0 : index
    %c0_50 = arith.constant 0 : index
    %220 = vector.load %arg10[%c0_49, %c0_50] : memref<64x1xf32, #tpu.memory_space<vmem>>, vector<64x1xf32>
    tpu.vector_store %arg10[%c0_49, %c0_50], %219 {strides = array<i32>} : memref<64x1xf32, #tpu.memory_space<vmem>>, vector<64x1xf32>,
    return
  }
  func.func @transform_0(%arg0: i32) -> (i32, i32) {
    %c0_i32 = arith.constant 0 : i32
    %c0_i32_0 = arith.constant 0 : i32
    return %arg0, %c0_i32 : i32, i32
  }
  func.func @transform_1(%arg0: i32) -> (i32, i32) {
    %c0_i32 = arith.constant 0 : i32
    %c0_i32_0 = arith.constant 0 : i32
    %c0_i32_1 = arith.constant 0 : i32
    return %c0_i32, %c0_i32_0 : i32, i32
  }
  func.func @transform_2(%arg0: i32) -> (i32, i32) {
    %c0_i32 = arith.constant 0 : i32
    %c0_i32_0 = arith.constant 0 : i32
    return %arg0, %c0_i32 : i32, i32
  }
  func.func @transform_3(%arg0: i32) -> (i32, i32) {
    %c0_i32 = arith.constant 0 : i32
    %c0_i32_0 = arith.constant 0 : i32
    %c0_i32_1 = arith.constant 0 : i32
    return %c0_i32, %c0_i32_0 : i32, i32
  }
  func.func @transform_4(%arg0: i32) -> (i32, i32) {
    %c0_i32 = arith.constant 0 : i32
    %c0_i32_0 = arith.constant 0 : i32
    %c0_i32_1 = arith.constant 0 : i32
    return %c0_i32, %c0_i32_0 : i32, i32
  }
  func.func @transform_5(%arg0: i32) -> (i32, i32) {
    %c0_i32 = arith.constant 0 : i32
    %c0_i32_0 = arith.constant 0 : i32
    %c0_i32_1 = arith.constant 0 : i32
    return %c0_i32, %c0_i32_0 : i32, i32
  }
  func.func @transform_6(%arg0: i32) -> (i32, i32) {
    %c0_i32 = arith.constant 0 : i32
    %c0_i32_0 = arith.constant 0 : i32
    %c0_i32_1 = arith.constant 0 : i32
    return %c0_i32, %c0_i32_0 : i32, i32
  }
  func.func @transform_7(%arg0: i32) -> (i32, i32) {
    %c0_i32 = arith.constant 0 : i32
    %c0_i32_0 = arith.constant 0 : i32
    %c0_i32_1 = arith.constant 0 : i32
    return %c0_i32, %c0_i32_0 : i32, i32
  }
  func.func @transform_8(%arg0: i32) -> (i32, i32) {
    %c0_i32 = arith.constant 0 : i32
    %c0_i32_0 = arith.constant 0 : i32
    %c0_i32_1 = arith.constant 0 : i32
    return %c0_i32, %c0_i32_0 : i32, i32
  }
  func.func @transform_9(%arg0: i32) -> (i32, i32) {
    %c0_i32 = arith.constant 0 : i32
    %c0_i32_0 = arith.constant 0 : i32
    return %arg0, %c0_i32 : i32, i32
  }
}

</mosaic_0001>

<bundles_post_ra>
// kernel: net_el_forward.1
= control target key start
LH: loop header
LB: loop body
LE: loop exit
PB: predicated region body
PF: predicated region fallthrough
CT: control target
= control target key end

     0   :  { %s3117_s0 = inlined_call_operand.vmem [shape: f32[128,1], index: 0, kind: input, shape index: {}]   ;;  %s3118_s1 = inlined_call_operand.vmem [shape: f32[1,128], index: 1, kind: input, shape index: {}]   ;;  %s3119_s2 = inlined_call_operand.vmem [shape: f32[128,128], index: 2, kind: input, shape index: {}]   ;;  %s3120_s3 = inlined_call_operand.vmem [shape: f32[6,30], index: 3, kind: input, shape index: {}]   ;;  %s3121_s4 = inlined_call_operand.vmem [shape: f32[6,30], index: 4, kind: input, shape index: {}]   ;;  %s3122_s5 = inlined_call_operand.hbm [shape: f32[6,30], index: 5, kind: input, shape index: {}]   ;;  %s3123_s6 = inlined_call_operand.vmem [shape: f32[1,30], index: 6, kind: input, shape index: {}]   ;;  %s3124_s7 = inlined_call_operand.vmem [shape: f32[1,30], index: 7, kind: input, shape index: {}]   ;;  %s3125_s8 = inlined_call_operand.<no memory space> [shape: f32[1,1], index: 8, kind: input, shape index: {}]   ;;  %s3126_s9 = inlined_call_operand.vmem [shape: f32[128,1], index: 9, kind: output, shape index: {}]  }
   0x1   :  { %v14_v0 = vstv %s3125_s8 }
   0x2   :  { %15 = vst [vmem:[#allocation2] sm:$0x1] %v14_v0 }
   0x3   :  { %16 = vsyncpa [#allocation4], 0  ;;  %s2187_s11 = smov 0  }
   0x4 LB: > { %s1861_s12 = sadd.s32 4294967295, %s2130_s11   ;;  %p1863_p0 = scmp.ge.s32.totalorder %s2130_s11, 1  ;;  %s2130_s11 = sphi %s2187_s11, %s22_s11  }
   0x5   : > { %p252_p1 = scmp.lt.s32.totalorder %s2130_s11, 3  ;;  %p2201_p3 = scmp.eq.s32.totalorder %s1861_s12, 0 }
   0x6   : > { %s2132_s14 = smov [#allocation3]   ;;  %s2092_s19 = scalar_lea.hbm %s3122_s5, 128 }
   0x7   : > { %p2195_p2 = pnand %p1863_p0, %p252_p1  ;;  %s274_s15 = sshll.u32 %s2132_s14, 4  ;;  %s275_s15 = int_to_ptr.vmem [resolvable:$true] %s274_s15 }
   0x8   : > { %s3144_s8 = scalar_select %p2201_p3, 1, 0 }
   0x9   : > { %s3143_s13 = scalar_select %p2195_p2, 1, 0 }
   0xa   : > { %p1881_p4 = pneg %p2195_p2  ;;  %p2093_p6 = scmp.ne.s32.totalorder %s3122_s5, %s2092_s19 }
   0xb   : > { %p2099_p10 = scmp.lt.u32.totalorder %s2092_s19, %s3122_s5 }
   0xc   : > { %p2209_p5 = pnand %p2201_p3, %p1881_p4 }
   0xe   : > { %p2094_p7 = pneg %p2209_p5 }
  0x10   : > { %p2095_p8 = pnand %p2094_p7, %p2093_p6 }
  0x12   : > { %p2096_p9 = pneg %p2095_p8 }
  0x14   : > { %p2101_p11 = pnand %p2099_p10, %p2096_p9 }
  0x16   : > { %2104 = shalt.err (!%p2101_p11)
}
  0x17   : > { %s2105_s24 = scalar_lea.vmem %s275_s15, 128  ;;  %p2113_p1 = scmp.lt.s32.totalorder %s275_s15, %s275_s15 }
  0x18   : > { %p2106_p12 = scmp.ne.s32.totalorder %s275_s15, %s2105_s24  ;;  %p2114_p4 = scmp.lt.s32.totalorder %s2105_s24, %s2105_s24 }
  0x1a   : > { %p2108_p13 = pnand %p2106_p12, %p2094_p7  ;;  %p2115_p3 = por %p2114_p4, %p2113_p1 }
  0x1c   : > { %p2109_p0 = pneg %p2108_p13 }
  0x1e   : > { %p2116_p2 = pnand %p2115_p3, %p2109_p0 }
  0x20   : > { %2119 = shalt.err (!%p2116_p2)
}
  0x21   : > { %1884 = dma.hbm_to_vmem [thread:$0]  (!%p2209_p5), %s3122_s5, 128, %s275_s15, [#allocation4]  }
  0x22   : > { %p3146_p6 = scmp.ne.s32.totalorder %s3143_s13, 0 }
  0x24   : > { %314 = sbr.rel (%p3146_p6) target bundleno = 1139 (0x473), region = 56 }
  0x2b   : > { %p3147_p8 = scmp.ne.s32.totalorder %s3144_s8, 0 }
  0x2d   : > { %2125 = dma.done.wait (%p3147_p8), [#allocation4], 128  }
  0x2e   : > { %2127 = vsyncadd (%p3147_p8), [#allocation4], 4294967168  ;;  %vm393_vm0 = vcmask 242688   ;;  %v390_v1 = vld [vmem:[%s3120_s3] sm:$0x3f]  ;;  %v2133_v8 = vmov 0   ;;  %v402_v9 = vlaneseq }
  0x2f   : > { %v391_v2 = vld [vmem:[%s3121_s4] sm:$0x3f]  ;;  %1898 = vset.pattern.permute.xlu0 %v2133_v8  ;;  %1897 = vset.pattern.permute.xlu1 %v2133_v8  ;;  %s1868_s10 = sshll.u32 %s1861_s12, 3  ;;  %vm1724_vm1 = vcmask 244736   ;;  %vm1772_vm2 = vcmask 7168  }
  0x30   : > { %v397_v3 = vld [vmem:[#allocation3] sm:$0x3f]  ;;  %v392_v4 = vmul.f32 %v391_v2, %v390_v1  ;;  %p356_p2 = scmp.lt.s32.totalorder %s1868_s10, 15  ;;  %v403_v11 = vshrl.u32 %v402_v9, 7 }
  0x31   : > { %v398_v5 = vmul.f32 %v397_v3, %v390_v1 }
  0x32   : > { %v394_v6 = vsel %vm393_vm0, %v392_v4, 0.0  ;;  %s3173_s10 = smov (!%p356_p2, %s1868_s10), 15  ;;  %v2251_v12 = vsub.s32 0, %v403_v11  ;;  %v2255_v15 = vsub.s32 1, %v403_v11  ;;  %v2269_v23 = vsub.s32 5, %v403_v11 }
  0x33   : > { %395 = vadd.xlane.f32.xlu0 %v394_v6  ;;  %v399_v7 = vsel %vm393_vm0, %v398_v5, 0.0  ;;  %s2243_s13 = sshll.u32 %s3173_s10, 3  ;;  %v2280_v30 = vsub.s32 2, %v403_v11  ;;  %v2303_v45 = vsub.s32 3, %v403_v11  ;;  %v2312_v53 = vsub.s32 4, %v403_v11 }
  0x34   : > { %s359_s15 = scalar_lea.vmem %s3117_s0, %s2243_s13  ;;  %3148 = vst [vmem:[#allocation6_spill] sm:$0xff] %v2251_v12  ;;  %3149 = vst [vmem:[#allocation7_spill] sm:$0xff] %v2255_v15  ;;  %s2357_s19 = scalar_lea.vmem %s3119_s2, %s2243_s13 }
  0x35   : > { %v2253_v14 = vld [vmem:[%s359_s15 + $0x10] sm:$0xff]  ;;  %v2258_v17 = vld [vmem:[%s359_s15] sm:$0xff]  ;;  %v2265_v21 = vld [vmem:[%s359_s15 + $0x8] sm:$0xff]  ;;  %3150 = vst [vmem:[#allocation8_spill] sm:$0xff] %v2269_v23  ;;  %s3096_s28 = scalar_lea.vmem %s3126_s9, %s2243_s13 }
  0x36   : > { %v377_v25 = vld [vmem:[%s359_s15 + $0x20] sm:$0xff]  ;;  %v2272_v26 = vld [vmem:[%s359_s15 + $0x18] sm:$0xff]  ;;  %v2278_v29 = vld [vmem:[%s359_s15 + $0x28] sm:$0xff]  ;;  %3151 = vst [vmem:[#allocation9_spill] sm:$0xff] %v2280_v30 }
  0x37   : > { %400 = vadd.xlane.f32.xlu0 %v399_v7  ;;  %v379_v32 = vld [vmem:[%s359_s15 + $0x30] sm:$0xff]  ;;  %v2283_v33 = vld [vmem:[%s359_s15 + $0x38] sm:$0xff]  ;;  %3152 = vst [vmem:[#allocation10_spill] sm:$0xff] %v2303_v45  ;;  %3153 = vst [vmem:[#allocation11_spill] sm:$0xff] %v2312_v53 }
  0xc0   : > { %v2245_v10 = vpop.xlane.xlu0 %395 }
  0xc4   : > { %v401_v13 = vpop.xlane.xlu0 %400 }
  0xc5   : > { %v405_v16 = vrot.slane %v401_v13, %v2251_v12  ;;  %v2261_v18 = vrot.slane %v401_v13, %v2255_v15  ;;  %v2275_v27 = vrot.slane %v401_v13, %v2269_v23  ;;  %v831_v34 = vrot.slane %v401_v13, %v2280_v30 }
  0xc6   : > { %v1043_v46 = vrot.slane %v401_v13, %v2303_v45  ;;  %v1255_v54 = vrot.slane %v401_v13, %v2312_v53 }
  0xc7   : > { %v408_v19 = vmul.f32 %v405_v16, %v2253_v14  ;;  %v406_v20 = vmul.f32 %v405_v16, %v2258_v17  ;;  %v620_v22 = vmul.f32 %v2261_v18, %v2265_v21  ;;  %v407_v24 = vmul.f32 %v405_v16, %v2265_v21 }
  0xc8   : > { %v623_v28 = vmul.f32 %v2261_v18, %v377_v25  ;;  %v409_v31 = vmul.f32 %v405_v16, %v2272_v26  ;;  %v2288_v35 = vmul.f32 %v2275_v27, %v2278_v29  ;;  %v625_v36 = vmul.f32 %v2261_v18, %v379_v32 }
  0xc9   : > { %427 = vperm.xlu0 %1898, %v408_v19   ;;  %417 = vperm.xlu1 %1897, %v406_v20   ;;  %v2293_v37 = vmul.f32 %v2275_v27, %v2283_v33  ;;  %v2296_v38 = vmul.f32 %v2275_v27, %v377_v25  ;;  %v2299_v39 = vmul.f32 %v2275_v27, %v379_v32  ;;  %v2348_v20 = vld [vmem:[%s3118_s1] sm:$0x1] }
  0xca   : > { %v410_v40 = vmul.f32 %v405_v16, %v377_v25  ;;  %v833_v41 = vmul.f32 %v831_v34, %v2265_v21  ;;  %v411_v42 = vmul.f32 %v405_v16, %v2278_v29  ;;  %v836_v43 = vmul.f32 %v831_v34, %v377_v25 }
  0xcb   : > { %v412_v44 = vmul.f32 %v405_v16, %v379_v32  ;;  %v838_v47 = vmul.f32 %v831_v34, %v379_v32  ;;  %v413_v48 = vmul.f32 %v405_v16, %v2283_v33  ;;  %v1045_v49 = vmul.f32 %v1043_v46, %v2265_v21 }
  0xcc   : > { %v619_v50 = vmul.f32 %v2261_v18, %v2258_v17  ;;  %v1048_v51 = vmul.f32 %v1043_v46, %v377_v25  ;;  %v621_v52 = vmul.f32 %v2261_v18, %v2253_v14  ;;  %v1050_v55 = vmul.f32 %v1043_v46, %v379_v32 }
  0xcd   : > { %641 = vperm.xlu0 %1898, %v620_v22   ;;  %422 = vperm.xlu1 %1897, %v407_v24   ;;  %v622_v56 = vmul.f32 %v2261_v18, %v2272_v26  ;;  %v1256_v57 = vmul.f32 %v1255_v54, %v2258_v17  ;;  %v624_v58 = vmul.f32 %v2261_v18, %v2278_v29 }
  0xce   : > { %v1258_v59 = vmul.f32 %v1255_v54, %v2253_v14  ;;  %v626_v60 = vmul.f32 %v2261_v18, %v2283_v33  ;;  %v1260_v61 = vmul.f32 %v1255_v54, %v377_v25  ;;  %v832_v62 = vmul.f32 %v831_v34, %v2258_v17 }
  0xcf   : > { %v1262_v63 = vmul.f32 %v1255_v54, %v379_v32  ;;  %v834_v0 = vmul.f32 %v831_v34, %v2253_v14  ;;  %v1468_v1 = vmul.f32 %v2275_v27, %v2258_v17  ;;  %v835_v2 = vmul.f32 %v831_v34, %v2272_v26 }
  0xd0   : > { %v1470_v3 = vmul.f32 %v2275_v27, %v2253_v14  ;;  %v837_v4 = vmul.f32 %v831_v34, %v2278_v29  ;;  %v839_v5 = vmul.f32 %v831_v34, %v2283_v33  ;;  %v1044_v6 = vmul.f32 %v1043_v46, %v2258_v17 }
  0xd1   : > { %656 = vperm.xlu0 %1898, %v623_v28   ;;  %432 = vperm.xlu1 %1897, %v409_v31   ;;  %v1046_v7 = vmul.f32 %v1043_v46, %v2253_v14  ;;  %v1047_v8 = vmul.f32 %v1043_v46, %v2272_v26  ;;  %v1049_v9 = vmul.f32 %v1043_v46, %v2278_v29 }
  0xd2   : > { %v1051_v11 = vmul.f32 %v1043_v46, %v2283_v33  ;;  %v1257_v13 = vmul.f32 %v1255_v54, %v2265_v21  ;;  %v1259_v16 = vmul.f32 %v1255_v54, %v2272_v26  ;;  %v1261_v17 = vmul.f32 %v1255_v54, %v2278_v29  ;;  %v2366_v46 = vld [vmem:[%s2357_s19] sm:$0xff] }
  0xd3   : > { %v1263_v14 = vmul.f32 %v1255_v54, %v2283_v33  ;;  %v1469_v18 = vmul.f32 %v2275_v27, %v2265_v21  ;;  %v1471_v19 = vmul.f32 %v2275_v27, %v2272_v26  ;;  %v414_v22 = vmul.f32 %v2245_v10, %v2348_v20  ;;  %v2360_v27 = vld [vmem:[%s2357_s19 + $0x8] sm:$0xff] }
  0xd5   : > { %666 = vperm.xlu0 %1898, %v625_v36   ;;  %437 = vperm.xlu1 %1897, %v410_v40   ;;  %v459_v25 = vrot.slane %v414_v22, %v2251_v12  ;;  %v2406_v22 = vld [vmem:[%s2357_s19 + $0x38] sm:$0xff] }
  0xd9   : > { %853 = vperm.xlu0 %1898, %v833_v41   ;;  %442 = vperm.xlu1 %1897, %v411_v42  }
  0xdd   : > { %868 = vperm.xlu0 %1898, %v836_v43   ;;  %447 = vperm.xlu1 %1897, %v412_v44  }
  0xe1   : > { %878 = vperm.xlu0 %1898, %v838_v47   ;;  %452 = vperm.xlu1 %1897, %v413_v48  }
  0xe5   : > { %1065 = vperm.xlu0 %1898, %v1045_v49   ;;  %636 = vperm.xlu1 %1897, %v619_v50  }
  0xe9   : > { %1080 = vperm.xlu0 %1898, %v1048_v51   ;;  %646 = vperm.xlu1 %1897, %v621_v52   ;;  %v631_v52 = vrot.slane %v2245_v10, %v2255_v15 }
  0xed   : > { %1090 = vperm.xlu0 %1898, %v1050_v55   ;;  %651 = vperm.xlu1 %1897, %v622_v56   ;;  %v2375_v55 = vld [vmem:[%s2357_s19 + $0x10] sm:$0xff] }
  0xf1   : > { %1272 = vperm.xlu0 %1898, %v1256_v57   ;;  %661 = vperm.xlu1 %1897, %v624_v58  }
  0xf5   : > { %1282 = vperm.xlu0 %1898, %v1258_v59   ;;  %671 = vperm.xlu1 %1897, %v626_v60   ;;  %v633_v60 = vmul.f32 %v631_v52, %v2348_v20 }
  0xf9   : > { %1292 = vperm.xlu0 %1898, %v1260_v61   ;;  %848 = vperm.xlu1 %1897, %v832_v62  }
  0xfd   : > { %1302 = vperm.xlu0 %1898, %v1262_v63   ;;  %858 = vperm.xlu1 %1897, %v834_v0   ;;  %v2383_v63 = vld [vmem:[%s2357_s19 + $0x18] sm:$0xff] }
 0x101   : > { %1484 = vperm.xlu0 %1898, %v1468_v1   ;;  %863 = vperm.xlu1 %1897, %v835_v2  }
 0x105   : > { %1494 = vperm.xlu0 %1898, %v1470_v3   ;;  %873 = vperm.xlu1 %1897, %v837_v4   ;;  %v2390_v4 = vrot.slane %v633_v60, %v2251_v12 }
 0x109   : > { %883 = vperm.xlu1 %1897, %v839_v5  }
 0x10d   : > { %1060 = vperm.xlu1 %1897, %v1044_v6  }
 0x111   : > { %1070 = vperm.xlu1 %1897, %v1046_v7  }
 0x115   : > { %1075 = vperm.xlu1 %1897, %v1047_v8  }
 0x119   : > { %1085 = vperm.xlu1 %1897, %v1049_v9   ;;  %v2395_v9 = vld [vmem:[%s2357_s19 + $0x20] sm:$0xff] }
 0x11d   : > { %1095 = vperm.xlu1 %1897, %v1051_v11  }
 0x121   : > { %1277 = vperm.xlu1 %1897, %v1257_v13  }
 0x125   : > { %1287 = vperm.xlu1 %1897, %v1259_v16  }
 0x129   : > { %1297 = vperm.xlu1 %1897, %v1261_v17  }
 0x12d   : > { %1307 = vperm.xlu1 %1897, %v1263_v14   ;;  %v843_v14 = vrot.slane %v2245_v10, %v2280_v30 }
 0x131   : > { %1489 = vperm.xlu1 %1897, %v1469_v18  }
 0x135   : > { %1499 = vperm.xlu1 %1897, %v1471_v19   ;;  %v2403_v19 = vld [vmem:[%s2357_s19 + $0x28] sm:$0xff] }
 0x148   : > { %v418_v24 = vpop.permute.xlu1 %417  ;;  %v428_v29 = vpop.permute.xlu0 %427 }
 0x149   : > { %v461_v28 = vadd.f32 %v459_v25, %v418_v24  ;;  %v463_v32 = vadd.f32 %v459_v25, %v428_v29 }
 0x14b   : > { %v469_v33 = vmul.f32 0.2, %v461_v28  ;;  %v471_v40 = vmul.f32 0.2, %v463_v32 }
 0x14c   : > { %v423_v31 = vpop.permute.xlu1 %422  ;;  %v642_v47 = vpop.permute.xlu0 %641 }
 0x14d   : > { %v462_v21 = vadd.f32 %v459_v25, %v423_v31  ;;  %v477_v43 = vmax.f32 %v461_v28, %v469_v33  ;;  %v479_v51 = vmax.f32 %v463_v32, %v471_v40  ;;  %v681_v7 = vadd.f32 %v2390_v4, %v642_v47 }
 0x14f   : > { %v470_v34 = vmul.f32 0.2, %v462_v21  ;;  %v2370_v50 = vadd.f32 %v477_v43, %v2366_v46  ;;  %v2379_v58 = vadd.f32 %v479_v51, %v2375_v55  ;;  %v689_v28 = vmul.f32 0.2, %v681_v7 }
 0x150   : > { %v433_v26 = vpop.permute.xlu1 %432  ;;  %v657_v61 = vpop.permute.xlu0 %656 }
 0x151   : > { %v478_v36 = vmax.f32 %v462_v21, %v470_v34  ;;  %v464_v41 = vadd.f32 %v459_v25, %v433_v26  ;;  %v684_v29 = vadd.f32 %v2390_v4, %v657_v61  ;;  %v845_v34 = vmul.f32 %v843_v14, %v2348_v20 }
 0x152   : > { %v697_v47 = vmax.f32 %v681_v7, %v689_v28 }
 0x153   : > { %v2363_v42 = vadd.f32 %v478_v36, %v2360_v27  ;;  %v472_v48 = vmul.f32 0.2, %v464_v41 }
 0x154   : > { %v438_v44 = vpop.permute.xlu1 %437  ;;  %v667_v8 = vpop.permute.xlu0 %666 }
 0x155   : > { %495 = vmax.xlane.f32.xlu0 %v2363_v42  ;;  %v465_v49 = vadd.f32 %v459_v25, %v438_v44  ;;  %v480_v59 = vmax.f32 %v464_v41, %v472_v48  ;;  %v686_v43 = vadd.f32 %v2390_v4, %v667_v8  ;;  %v2423_v44 = vld [vmem:[%s2357_s19 + $0x30] sm:$0xff]  ;;  %v692_v48 = vmul.f32 0.2, %v684_v29 }
 0x157   : > { %v473_v56 = vmul.f32 0.2, %v465_v49  ;;  %v2387_v2 = vadd.f32 %v480_v59, %v2383_v63  ;;  %v694_v60 = vmul.f32 0.2, %v686_v43 }
 0x158   : > { %v443_v54 = vpop.permute.xlu1 %442  ;;  %v854_v26 = vpop.permute.xlu0 %853 }
 0x159   : > { %493 = vmax.xlane.f32.xlu1 %v2370_v50  ;;  %v466_v57 = vadd.f32 %v459_v25, %v443_v54  ;;  %v481_v3 = vmax.f32 %v465_v49, %v473_v56  ;;  %v2432_v54 = vrot.slane %v845_v34, %v2251_v12 }
 0x15b   : > { %v474_v0 = vmul.f32 0.2, %v466_v57  ;;  %v2398_v16 = vadd.f32 %v481_v3, %v2395_v9  ;;  %v893_v61 = vadd.f32 %v2432_v54, %v854_v26 }
 0x15c   : > { %v448_v62 = vpop.permute.xlu1 %447 }
 0x15d   : > { %497 = vmax.xlane.f32.xlu1 %v2379_v58  ;;  %v467_v1 = vadd.f32 %v459_v25, %v448_v62  ;;  %v482_v17 = vmax.f32 %v466_v57, %v474_v0  ;;  %v869_v62 = vpop.permute.xlu0 %868 }
 0x15f   : > { %v475_v11 = vmul.f32 0.2, %v467_v1  ;;  %v2412_v21 = vadd.f32 %v482_v17, %v2403_v19  ;;  %v896_v17 = vadd.f32 %v2432_v54, %v869_v62 }
 0x160   : > { %v453_v5 = vpop.permute.xlu1 %452 }
 0x161   : > { %v468_v6 = vadd.f32 %v459_v25, %v453_v5  ;;  %499 = vmax.xlane.f32.xlu1 %v2387_v2  ;;  %v483_v33 = vmax.f32 %v467_v1, %v475_v11  ;;  %v2439_v1 = vadd.f32 %v697_v47, %v2360_v27  ;;  %v700_v5 = vmax.f32 %v684_v29, %v692_v48 }
 0x162   : > { %v901_v11 = vmul.f32 0.2, %v893_v61  ;;  %v904_v26 = vmul.f32 0.2, %v896_v17 }
 0x163   : > { %v476_v13 = vmul.f32 0.2, %v468_v6  ;;  %v2426_v51 = vadd.f32 %v483_v33, %v2423_v44 }
 0x164   : > { %v637_v18 = vpop.permute.xlu1 %636  ;;  %v909_v34 = vmax.f32 %v893_v61, %v901_v11 }
 0x165   : > { %v680_v24 = vadd.f32 %v2390_v4, %v637_v18  ;;  %501 = vmax.xlane.f32.xlu1 %v2398_v16  ;;  %v484_v25 = vmax.f32 %v468_v6, %v476_v13  ;;  %v702_v13 = vmax.f32 %v686_v43, %v694_v60  ;;  %v2449_v18 = vadd.f32 %v700_v5, %v2395_v9 }
 0x166   : > { %v2468_v48 = vadd.f32 %v909_v34, %v2360_v27 }
 0x167   : > { %v688_v31 = vmul.f32 0.2, %v680_v24  ;;  %v2415_v32 = vadd.f32 %v484_v25, %v2406_v22  ;;  %v879_v25 = vpop.permute.xlu0 %878  ;;  %v2458_v33 = vadd.f32 %v702_v13, %v2423_v44 }
 0x168   : > { %v647_v36 = vpop.permute.xlu1 %646 }
 0x169   : > { %v682_v40 = vadd.f32 %v2390_v4, %v647_v36  ;;  %503 = vmax.xlane.f32.xlu1 %v2412_v21  ;;  %507 = vmax.xlane.f32.xlu0 %v2415_v32  ;;  %v696_v41 = vmax.f32 %v680_v24, %v688_v31  ;;  %v898_v36 = vadd.f32 %v2432_v54, %v879_v25 }
 0x16b   : > { %v690_v49 = vmul.f32 0.2, %v682_v40  ;;  %v2429_v52 = vadd.f32 %v696_v41, %v2366_v46 }
 0x16c   : > { %v652_v56 = vpop.permute.xlu1 %651 }
 0x16d   : > { %v683_v57 = vadd.f32 %v2390_v4, %v652_v56  ;;  %505 = vmax.xlane.f32.xlu1 %v2426_v51  ;;  %712 = vmax.xlane.f32.xlu0 %v2429_v52  ;;  %v698_v59 = vmax.f32 %v682_v40, %v690_v49  ;;  %v906_v49 = vmul.f32 0.2, %v898_v36 }
 0x16f   : > { %v691_v0 = vmul.f32 0.2, %v683_v57  ;;  %v2442_v3 = vadd.f32 %v698_v59, %v2375_v55  ;;  %v912_v59 = vmax.f32 %v896_v17, %v904_v26 }
 0x170   : > { %v662_v6 = vpop.permute.xlu1 %661 }
 0x171   : > { %v685_v7 = vadd.f32 %v2390_v4, %v662_v6  ;;  %714 = vmax.xlane.f32.xlu1 %v2439_v1  ;;  %716 = vmax.xlane.f32.xlu0 %v2442_v3  ;;  %v699_v8 = vmax.f32 %v683_v57, %v691_v0  ;;  %v2477_v5 = vadd.f32 %v912_v59, %v2395_v9 }
 0x172   : > { %v1055_v59 = vrot.slane %v2245_v10, %v2303_v45 }
 0x173   : > { %v693_v14 = vmul.f32 0.2, %v685_v7  ;;  %v2452_v24 = vadd.f32 %v699_v8, %v2383_v63 }
 0x174   : > { %v672_v28 = vpop.permute.xlu1 %671 }
 0x175   : > { %v687_v29 = vadd.f32 %v2390_v4, %v672_v28  ;;  %720 = vmax.xlane.f32.xlu1 %v2449_v18  ;;  %718 = vmax.xlane.f32.xlu0 %v2452_v24  ;;  %v701_v31 = vmax.f32 %v685_v7, %v693_v14  ;;  %v914_v7 = vmax.f32 %v898_v36, %v906_v49 }
 0x177   : > { %v695_v40 = vmul.f32 0.2, %v687_v29  ;;  %v2462_v41 = vadd.f32 %v701_v31, %v2403_v19  ;;  %v2486_v14 = vadd.f32 %v914_v7, %v2423_v44 }
 0x178   : > { %v849_v43 = vpop.permute.xlu1 %848 }
 0x179   : > { %v892_v47 = vadd.f32 %v2432_v54, %v849_v43  ;;  %724 = vmax.xlane.f32.xlu1 %v2458_v33  ;;  %722 = vmax.xlane.f32.xlu0 %v2462_v41  ;;  %v703_v4 = vmax.f32 %v687_v29, %v695_v40 }
 0x17b   : > { %v900_v56 = vmul.f32 0.2, %v892_v47  ;;  %v2471_v57 = vadd.f32 %v703_v4, %v2406_v22 }
 0x17c   : > { %v859_v60 = vpop.permute.xlu1 %858 }
 0x17d   : > { %v894_v61 = vadd.f32 %v2432_v54, %v859_v60  ;;  %926 = vmax.xlane.f32.xlu1 %v2468_v48  ;;  %726 = vmax.xlane.f32.xlu0 %v2471_v57  ;;  %v908_v62 = vmax.f32 %v892_v47, %v900_v56 }
 0x17f   : > { %v902_v0 = vmul.f32 0.2, %v894_v61  ;;  %v2480_v6 = vadd.f32 %v908_v62, %v2366_v46  ;;  %v1057_v62 = vmul.f32 %v1055_v59, %v2348_v20 }
 0x180   : > { %v864_v8 = vpop.permute.xlu1 %863 }
 0x181   : > { %v895_v11 = vadd.f32 %v2432_v54, %v864_v8  ;;  %932 = vmax.xlane.f32.xlu1 %v2477_v5  ;;  %924 = vmax.xlane.f32.xlu0 %v2480_v6  ;;  %v910_v13 = vmax.f32 %v894_v61, %v902_v0  ;;  %v1102_v7 = vrot.slane %v1057_v62, %v2251_v12 }
 0x183   : > { %v903_v17 = vmul.f32 0.2, %v895_v11  ;;  %v2489_v25 = vadd.f32 %v910_v13, %v2375_v55 }
 0x184   : > { %v874_v28 = vpop.permute.xlu1 %873 }
 0x185   : > { %v897_v29 = vadd.f32 %v2432_v54, %v874_v28  ;;  %936 = vmax.xlane.f32.xlu1 %v2486_v14  ;;  %928 = vmax.xlane.f32.xlu0 %v2489_v25  ;;  %v911_v31 = vmax.f32 %v895_v11, %v903_v17 }
 0x187   : > { %v905_v34 = vmul.f32 0.2, %v897_v29  ;;  %v2495_v26 = vadd.f32 %v911_v31, %v2383_v63 }
 0x188   : > { %v884_v36 = vpop.permute.xlu1 %883 }
 0x189   : > { %v899_v40 = vadd.f32 %v2432_v54, %v884_v36  ;;  %930 = vmax.xlane.f32.xlu0 %v2495_v26  ;;  %v913_v43 = vmax.f32 %v897_v29, %v905_v34  ;;  %v1066_v54 = vpop.permute.xlu0 %1065 }
 0x18a   : > { %v1105_v11 = vadd.f32 %v1102_v7, %v1066_v54 }
 0x18b   : > { %v907_v47 = vmul.f32 0.2, %v899_v40  ;;  %v2500_v4 = vadd.f32 %v913_v43, %v2403_v19 }
 0x18c   : > { %v1061_v60 = vpop.permute.xlu1 %1060  ;;  %v1113_v13 = vmul.f32 0.2, %v1105_v11 }
 0x18d   : > { %934 = vmax.xlane.f32.xlu0 %v2500_v4  ;;  %v915_v49 = vmax.f32 %v899_v40, %v907_v47  ;;  %v1081_v61 = vpop.permute.xlu0 %1080 }
 0x18e   : > { %v1108_v17 = vadd.f32 %v1102_v7, %v1081_v61  ;;  %v1121_v36 = vmax.f32 %v1105_v11, %v1113_v13 }
 0x18f   : > { %v2504_v56 = vadd.f32 %v915_v49, %v2406_v22  ;;  %v1104_v49 = vadd.f32 %v1102_v7, %v1061_v60 }
 0x190   : > { %v1071_v0 = vpop.permute.xlu1 %1070  ;;  %v2523_v54 = vadd.f32 %v1121_v36, %v2360_v27 }
 0x191   : > { %938 = vmax.xlane.f32.xlu0 %v2504_v56  ;;  %v1091_v8 = vpop.permute.xlu0 %1090  ;;  %v1112_v11 = vmul.f32 0.2, %v1104_v49  ;;  %v1106_v13 = vadd.f32 %v1102_v7, %v1071_v0 }
 0x192   : > { %v1110_v31 = vadd.f32 %v1102_v7, %v1091_v8 }
 0x194   : > { %v1118_v47 = vmul.f32 0.2, %v1110_v31 }
 0x195   : > { %v1273_v28 = vpop.permute.xlu0 %1272 }
 0x196   : > { %1509 = vperm.xlu1 %1897, %v2288_v35   ;;  %v1267_v35 = vrot.slane %v2245_v10, %v2312_v53  ;;  %v1126_v53 = vmax.f32 %v1110_v31, %v1118_v47 }
 0x198   : > { %v1269_v29 = vmul.f32 %v1267_v35, %v2348_v20  ;;  %v2533_v30 = vadd.f32 %v1126_v53, %v2423_v44 }
 0x199   : > { %v1283_v40 = vpop.permute.xlu0 %1282 }
 0x19a   : > { %1519 = vperm.xlu1 %1897, %v2293_v37   ;;  %v1076_v37 = vpop.permute.xlu1 %1075 }
 0x19d   : > { %v1293_v35 = vpop.permute.xlu0 %1292 }
 0x19e   : > { %v1086_v34 = vpop.permute.xlu1 %1085 }
 0x19f   : > { %v1109_v15 = vadd.f32 %v1102_v7, %v1086_v34 }
 0x1a2   : > { %v1096_v61 = vpop.permute.xlu1 %1095 }
 0x1a6   : > { %v1278_v45 = vpop.permute.xlu1 %1277 }
 0x1a7   : > { %1504 = vperm.xlu0 %1898, %v2296_v38   ;;  %v1116_v38 = vmul.f32 0.2, %v1108_v17 }
 0x1a9   : > { %v1124_v59 = vmax.f32 %v1108_v17, %v1116_v38  ;;  %v1114_v17 = vmul.f32 0.2, %v1106_v13  ;;  %v1107_v38 = vadd.f32 %v1102_v7, %v1076_v37 }
 0x1ab   : > { %1514 = vperm.xlu0 %1898, %v2299_v39   ;;  %v2519_v39 = vrot.slane %v1269_v29, %v2251_v12  ;;  %v2528_v29 = vadd.f32 %v1124_v59, %v2395_v9  ;;  %v1115_v47 = vmul.f32 0.2, %v1107_v38 }
 0x1ad   : > { %v1316_v43 = vadd.f32 %v2519_v39, %v1273_v28  ;;  %v1318_v8 = vadd.f32 %v2519_v39, %v1283_v40  ;;  %3154 = vst [vmem:[#allocation12_spill] sm:$0xff] %v2528_v29  ;;  %v1320_v28 = vadd.f32 %v2519_v39, %v1293_v35  ;;  %v1120_v40 = vmax.f32 %v1104_v49, %v1112_v11 }
 0x1ae   : > { %v1117_v49 = vmul.f32 0.2, %v1109_v15  ;;  %v1111_v35 = vadd.f32 %v1102_v7, %v1096_v61  ;;  %v2561_v61 = vpop.permute.xlu0 %1302 }
 0x1af   : > { %v1324_v62 = vmul.f32 0.2, %v1316_v43  ;;  %v1326_v60 = vmul.f32 0.2, %v1318_v8  ;;  %v1328_v0 = vmul.f32 0.2, %v1320_v28 }
 0x1b0   : > { %v1125_v7 = vmax.f32 %v1109_v15, %v1117_v49 }
 0x1b1   : > { %v1332_v36 = vmax.f32 %v1316_v43, %v1324_v62  ;;  %v1334_v31 = vmax.f32 %v1318_v8, %v1326_v60  ;;  %v1122_v43 = vmax.f32 %v1106_v13, %v1114_v17  ;;  %v1288_v62 = vpop.permute.xlu1 %1287  ;;  %v1336_v37 = vmax.f32 %v1320_v28, %v1328_v0 }
 0x1b2   : > { %v1123_v8 = vmax.f32 %v1107_v38, %v1115_v47  ;;  %v1119_v13 = vmul.f32 0.2, %v1111_v35  ;;  %v1317_v60 = vadd.f32 %v2519_v39, %v1278_v45  ;;  %v1319_v38 = vadd.f32 %v2519_v39, %v1288_v62 }
 0x1b3   : > { %v2537_v59 = vadd.f32 %v1332_v36, %v2366_v46  ;;  %v2545_v53 = vadd.f32 %v1334_v31, %v2375_v55  ;;  %v2548_v11 = vadd.f32 %v1122_v43, %v2375_v55  ;;  %v2553_v34 = vadd.f32 %v1336_v37, %v2395_v9  ;;  %v2572_v31 = vpop.permute.xlu0 %1484 }
 0x1b4   : > { %v2559_v28 = vadd.f32 %v1123_v8, %v2383_v63  ;;  %v1325_v17 = vmul.f32 0.2, %v1317_v60  ;;  %v1127_v0 = vmax.f32 %v1111_v35, %v1119_v13  ;;  %v1327_v15 = vmul.f32 0.2, %v1319_v38 }
 0x1b5   : > { %3155 = vst [vmem:[#allocation13_spill] sm:$0xff] %v2545_v53  ;;  %3156 = vst [vmem:[#allocation14_spill] sm:$0xff] %v2553_v34  ;;  %v2556_v36 = vpop.permute.xlu1 %1297 }
 0x1b6   : > { %v2575_v47 = vadd.f32 %v1127_v0, %v2406_v22  ;;  %v1333_v43 = vmax.f32 %v1317_v60, %v1325_v17  ;;  %v1335_v49 = vmax.f32 %v1319_v38, %v1327_v15 }
 0x1b7   : > { %v2583_v35 = vpop.permute.xlu0 %1494 }
 0x1b8   : > { %3157 = vst [vmem:[#allocation15_spill] sm:$0xff] %v2575_v47  ;;  %v2581_v62 = vadd.f32 %v1333_v43, %v2360_v27  ;;  %v2587_v8 = vadd.f32 %v1335_v49, %v2383_v63 }
 0x1b9   : > { %v2569_v45 = vpop.permute.xlu1 %1307 }
 0x1ba   : > { %3158 = vst [vmem:[#allocation16_spill] sm:$0xff] %v2581_v62  ;;  %3159 = vst [vmem:[#allocation17_spill] sm:$0xff] %v2587_v8 }
 0x1bd   : > { %v2578_v37 = vpop.permute.xlu1 %1489 }
 0x1be   : > { %1138 = vmax.xlane.f32.xlu1 %v2523_v54 }
 0x1c1   : > { %v2589_v13 = vpop.permute.xlu1 %1499 }
 0x1c2   : > { %1144 = vmax.xlane.f32.xlu1 %v2528_v29  ;;  %v2540_v29 = vadd.f32 %v1120_v40, %v2366_v46  ;;  %v2567_v40 = vadd.f32 %v1125_v7, %v2403_v19 }
 0x1c6   : > { %1148 = vmax.xlane.f32.xlu1 %v2533_v30 }
 0x1ca   : > { %1348 = vmax.xlane.f32.xlu1 %v2537_v59  ;;  %1136 = vmax.xlane.f32.xlu0 %v2540_v29 }
 0x1ce   : > { %1352 = vmax.xlane.f32.xlu1 %v2545_v53  ;;  %1140 = vmax.xlane.f32.xlu0 %v2548_v11 }
 0x1d2   : > { %1356 = vmax.xlane.f32.xlu1 %v2553_v34  ;;  %1142 = vmax.xlane.f32.xlu0 %v2559_v28 }
 0x1d6   : > { %1146 = vmax.xlane.f32.xlu0 %v2567_v40 }
 0x1da   : > { %1150 = vmax.xlane.f32.xlu0 %v2575_v47 }
 0x1de   : > { %1350 = vmax.xlane.f32.xlu0 %v2581_v62 }
 0x1e2   : > { %v496_v7 = vpop.xlane.xlu0 %495  ;;  %1354 = vmax.xlane.f32.xlu0 %v2587_v8 }
 0x1e3   : > { %v510_v60 = vsub.f32 %v2363_v42, %v496_v7 }
 0x1e5   : > { %v519_v17 = vmul.f32 1.442695, %v510_v60 }
 0x1e6   : > { %v494_v0 = vpop.xlane.xlu1 %493 }
 0x1e7   : > { %1899 = vpow2.f32 %v519_v17  ;;  %v509_v43 = vsub.f32 %v2370_v50, %v494_v0 }
 0x1e9   : > { %v517_v38 = vmul.f32 1.442695, %v509_v43 }
 0x1ea   : > { %v498_v15 = vpop.xlane.xlu1 %497 }
 0x1eb   : > { %1901 = vpow2.f32 %v517_v38  ;;  %v511_v34 = vsub.f32 %v2379_v58, %v498_v15 }
 0x1ed   : > { %v521_v62 = vmul.f32 1.442695, %v511_v34 }
 0x1ee   : > { %v500_v49 = vpop.xlane.xlu1 %499 }
 0x1ef   : > { %1903 = vpow2.f32 %v521_v62  ;;  %v512_v53 = vsub.f32 %v2387_v2, %v500_v49 }
 0x1f1   : > { %v2596_v47 = vpop.eup %1899  ;;  %v523_v8 = vmul.f32 1.442695, %v512_v53 }
 0x1f2   : > { %535 = vadd.xlane.f32.xlu0 %v2596_v47  ;;  %v502_v42 = vpop.xlane.xlu1 %501 }
 0x1f3   : > { %1905 = vpow2.f32 %v523_v8  ;;  %v513_v7 = vsub.f32 %v2398_v16, %v502_v42 }
 0x1f5   : > { %v2600_v50 = vpop.eup %1901  ;;  %v525_v60 = vmul.f32 1.442695, %v513_v7 }
 0x1f6   : > { %v508_v17 = vpop.xlane.xlu0 %507  ;;  %533 = vadd.xlane.f32.xlu1 %v2600_v50  ;;  %v504_v58 = vpop.xlane.xlu1 %503 }
 0x1f7   : > { %1907 = vpow2.f32 %v525_v60  ;;  %v516_v34 = vsub.f32 %v2415_v32, %v508_v17  ;;  %v514_v2 = vsub.f32 %v2412_v21, %v504_v58 }
 0x1f9   : > { %v2605_v62 = vpop.eup %1903  ;;  %v527_v53 = vmul.f32 1.442695, %v514_v2  ;;  %v531_v16 = vmul.f32 1.442695, %v516_v34 }
 0x1fa   : > { %v713_v0 = vpop.xlane.xlu0 %712  ;;  %537 = vadd.xlane.f32.xlu1 %v2605_v62  ;;  %v506_v8 = vpop.xlane.xlu1 %505 }
 0x1fb   : > { %v728_v43 = vsub.f32 %v2429_v52, %v713_v0  ;;  %v515_v38 = vsub.f32 %v2426_v51, %v506_v8  ;;  %1909 = vpow2.f32 %v527_v53 }
 0x1fc   : > { %1911 = vpow2.f32 %v531_v16 }
 0x1fd   : > { %v2610_v15 = vpop.eup %1905  ;;  %v529_v49 = vmul.f32 1.442695, %v515_v38  ;;  %v736_v32 = vmul.f32 1.442695, %v728_v43 }
 0x1fe   : > { %v717_v42 = vpop.xlane.xlu0 %716  ;;  %539 = vadd.xlane.f32.xlu0 %v2610_v15  ;;  %v715_v21 = vpop.xlane.xlu1 %714 }
 0x1ff   : > { %v729_v7 = vsub.f32 %v2439_v1, %v715_v21  ;;  %1913 = vpow2.f32 %v529_v49  ;;  %v730_v60 = vsub.f32 %v2442_v3, %v717_v42 }
 0x200   : > { %1915 = vpow2.f32 %v736_v32 }
 0x201   : > { %v2615_v17 = vpop.eup %1907  ;;  %v738_v52 = vmul.f32 1.442695, %v729_v7  ;;  %v740_v2 = vmul.f32 1.442695, %v730_v60 }
 0x202   : > { %v719_v58 = vpop.xlane.xlu0 %718  ;;  %541 = vadd.xlane.f32.xlu1 %v2615_v17  ;;  %v721_v51 = vpop.xlane.xlu1 %720 }
 0x203   : > { %v731_v34 = vsub.f32 %v2452_v24, %v719_v58  ;;  %1917 = vpow2.f32 %v738_v52  ;;  %v732_v53 = vsub.f32 %v2449_v18, %v721_v51 }
 0x205   : > { %v742_v0 = vmul.f32 1.442695, %v731_v34  ;;  %v2620_v8 = vpop.eup %1909  ;;  %v744_v43 = vmul.f32 1.442695, %v732_v53 }
 0x206   : > { %v723_v1 = vpop.xlane.xlu0 %722  ;;  %v725_v16 = vpop.xlane.xlu1 %724  ;;  %543 = vadd.xlane.f32.xlu0 %v2620_v8 }
 0x207   : > { %1919 = vpow2.f32 %v742_v0  ;;  %v733_v3 = vsub.f32 %v2462_v41, %v723_v1  ;;  %v734_v38 = vsub.f32 %v2458_v33, %v725_v16  ;;  %v2625_v49 = vpop.eup %1911 }
 0x208   : > { %1921 = vpow2.f32 %v740_v2 }
 0x209   : > { %v746_v24 = vmul.f32 1.442695, %v733_v3  ;;  %v2627_v42 = vpop.eup %1913  ;;  %v748_v41 = vmul.f32 1.442695, %v734_v38 }
 0x20a   : > { %v727_v18 = vpop.xlane.xlu0 %726  ;;  %v927_v21 = vpop.xlane.xlu1 %926  ;;  %547 = vadd.xlane.f32.xlu0 %v2625_v49  ;;  %545 = vadd.xlane.f32.xlu1 %v2627_v42 }
 0x20b   : > { %1923 = vpow2.f32 %v746_v24  ;;  %v735_v32 = vsub.f32 %v2471_v57, %v727_v18  ;;  %v941_v7 = vsub.f32 %v2468_v48, %v927_v21  ;;  %v2633_v60 = vpop.eup %1915 }
 0x20c   : > { %1925 = vpow2.f32 %v744_v43 }
 0x20d   : > { %v750_v33 = vmul.f32 1.442695, %v735_v32  ;;  %v2635_v52 = vpop.eup %1917  ;;  %v950_v34 = vmul.f32 1.442695, %v941_v7 }
 0x20e   : > { %v925_v58 = vpop.xlane.xlu0 %924  ;;  %752 = vadd.xlane.f32.xlu1 %v2633_v60  ;;  %754 = vadd.xlane.f32.xlu0 %v2635_v52  ;;  %v933_v57 = vpop.xlane.xlu1 %932 }
 0x20f   : > { %1927 = vpow2.f32 %v750_v33  ;;  %v940_v51 = vsub.f32 %v2480_v6, %v925_v58  ;;  %v944_v6 = vsub.f32 %v2477_v5, %v933_v57 }
 0x210   : > { %1929 = vpow2.f32 %v748_v41 }
 0x211   : > { %v2640_v2 = vpop.eup %1919  ;;  %v948_v53 = vmul.f32 1.442695, %v940_v51 }
 0x212   : > { %v2642_v48 = vpop.eup %1921  ;;  %v929_v0 = vpop.xlane.xlu0 %928  ;;  %758 = vadd.xlane.f32.xlu0 %v2640_v2 }
 0x213   : > { %1931 = vpow2.f32 %v948_v53  ;;  %v942_v1 = vsub.f32 %v2489_v25, %v929_v0  ;;  %756 = vadd.xlane.f32.xlu1 %v2642_v48  ;;  %v937_v43 = vpop.xlane.xlu1 %936  ;;  %v956_v25 = vmul.f32 1.442695, %v944_v6 }
 0x214   : > { %1933 = vpow2.f32 %v950_v34  ;;  %v946_v21 = vsub.f32 %v2486_v14, %v937_v43 }
 0x215   : > { %v2648_v16 = vpop.eup %1923  ;;  %v952_v3 = vmul.f32 1.442695, %v942_v1 }
 0x216   : > { %v2650_v38 = vpop.eup %1925  ;;  %v931_v24 = vpop.xlane.xlu0 %930  ;;  %762 = vadd.xlane.f32.xlu0 %v2648_v16 }
 0x217   : > { %1935 = vpow2.f32 %v952_v3  ;;  %v943_v18 = vsub.f32 %v2495_v26, %v931_v24  ;;  %760 = vadd.xlane.f32.xlu1 %v2650_v38  ;;  %v960_v26 = vmul.f32 1.442695, %v946_v21 }
 0x219   : > { %v2656_v32 = vpop.eup %1927  ;;  %v954_v5 = vmul.f32 1.442695, %v943_v18 }
 0x21a   : > { %v1930_v41 = vpop.eup %1929  ;;  %v935_v7 = vpop.xlane.xlu0 %934  ;;  %766 = vadd.xlane.f32.xlu0 %v2656_v32 }
 0x21b   : > { %1937 = vpow2.f32 %v954_v5  ;;  %v945_v33 = vsub.f32 %v2500_v4, %v935_v7  ;;  %764 = vadd.xlane.f32.xlu1 %v1930_v41 }
 0x21c   : > { %1939 = vpow2.f32 %v956_v25 }
 0x21d   : > { %v1932_v58 = vpop.eup %1931  ;;  %v958_v51 = vmul.f32 1.442695, %v945_v33  ;;  %v1510_v33 = vpop.permute.xlu1 %1509 }
 0x21e   : > { %v1934_v57 = vpop.eup %1933  ;;  %v939_v34 = vpop.xlane.xlu0 %938 }
 0x21f   : > { %1941 = vpow2.f32 %v958_v51  ;;  %v947_v14 = vsub.f32 %v2504_v56, %v939_v34  ;;  %964 = vadd.xlane.f32.xlu1 %v1932_v58  ;;  %966 = vadd.xlane.f32.xlu0 %v1934_v57  ;;  %v2669_v56 = vrot.slane %v2348_v20, %v2251_v12 }
 0x220   : > { %1943 = vpow2.f32 %v960_v26 }
 0x221   : > { %v1936_v53 = vpop.eup %1935  ;;  %v962_v0 = vmul.f32 1.442695, %v947_v14  ;;  %v555_v24 = vmul.f32 %v2600_v50, %v2669_v56  ;;  %v556_v18 = vmul.f32 %v2596_v47, %v2669_v56  ;;  %v557_v25 = vmul.f32 %v2605_v62, %v2669_v56 }
 0x222   : > { %v558_v21 = vmul.f32 %v2610_v15, %v2669_v56  ;;  %v559_v5 = vmul.f32 %v2615_v17, %v2669_v56  ;;  %v560_v50 = vmul.f32 %v2620_v8, %v2669_v56  ;;  %v561_v7 = vmul.f32 %v2627_v42, %v2669_v56 }
 0x223   : > { %1945 = vpow2.f32 %v962_v0  ;;  %968 = vadd.xlane.f32.xlu1 %v1936_v53  ;;  %v562_v47 = vmul.f32 %v2625_v49, %v2669_v56  ;;  %v768_v62 = vmul.f32 %v2633_v60, %v2669_v56  ;;  %v769_v15 = vmul.f32 %v2635_v52, %v2669_v56 }
 0x224   : > { %v770_v17 = vmul.f32 %v2642_v48, %v2669_v56  ;;  %v771_v8 = vmul.f32 %v2640_v2, %v2669_v56  ;;  %v772_v42 = vmul.f32 %v2650_v38, %v2669_v56  ;;  %v773_v49 = vmul.f32 %v2648_v16, %v2669_v56 }
 0x225   : > { %v1938_v4 = vpop.eup %1937  ;;  %v774_v60 = vmul.f32 %v1930_v41, %v2669_v56  ;;  %v1479_v52 = vrot.slane %v2245_v10, %v2269_v23  ;;  %v775_v48 = vmul.f32 %v2656_v32, %v2669_v56  ;;  %v980_v26 = vmul.f32 %v1932_v58, %v2669_v56  ;;  %v1520_v32 = vpop.permute.xlu1 %1519 }
 0x226   : > { %v1940_v1 = vpop.eup %1939  ;;  %970 = vadd.xlane.f32.xlu0 %v1938_v4  ;;  %v1505_v2 = vpop.permute.xlu0 %1504  ;;  %v981_v16 = vmul.f32 %v1934_v57, %v2669_v56  ;;  %v1322_v41 = vadd.f32 %v2519_v39, %v2561_v61  ;;  %v982_v51 = vmul.f32 %v1936_v53, %v2669_v56  ;;  %v1321_v58 = vadd.f32 %v2519_v39, %v2556_v36 }
 0x227   : > { %972 = vadd.xlane.f32.xlu1 %v1940_v1  ;;  %v1481_v38 = vmul.f32 %v1479_v52, %v2348_v20  ;;  %v983_v20 = vmul.f32 %v1938_v4, %v2669_v56  ;;  %v984_v61 = vmul.f32 %v1940_v1, %v2669_v56 }
 0x228   : > { %v1330_v14 = vmul.f32 0.2, %v1322_v41 }
 0x229   : > { %v2661_v6 = vpop.eup %1941  ;;  %v2714_v10 = vrot.slane %v1481_v38, %v2251_v12 }
 0x22a   : > { %v2663_v3 = vpop.eup %1943  ;;  %974 = vadd.xlane.f32.xlu0 %v2661_v6  ;;  %v1515_v34 = vpop.permute.xlu0 %1514  ;;  %v1338_v36 = vmax.f32 %v1322_v41, %v1330_v14 }
 0x22b   : > { %976 = vadd.xlane.f32.xlu1 %v2663_v3  ;;  %v1528_v57 = vadd.f32 %v2714_v10, %v2572_v31  ;;  %v1530_v4 = vadd.f32 %v2714_v10, %v2583_v35  ;;  %v986_v31 = vmul.f32 %v2663_v3, %v2669_v56  ;;  %v1529_v1 = vadd.f32 %v2714_v10, %v2578_v37 }
 0x22c   : > { %v2736_v35 = vadd.f32 %v1338_v36, %v2423_v44  ;;  %v1531_v37 = vadd.f32 %v2714_v10, %v2589_v13 }
 0x22d   : > { %v2671_v43 = vpop.eup %1945  ;;  %v1537_v3 = vmul.f32 0.2, %v1529_v1 }
 0x22e   : > { %978 = vadd.xlane.f32.xlu0 %v2671_v43  ;;  %v1539_v13 = vmul.f32 0.2, %v1531_v37 }
 0x22f   : > { %563 = vadd.xlane.f32.xlu1 %v555_v24  ;;  %v1329_v24 = vmul.f32 0.2, %v1321_v58 }
 0x232   : > { %565 = vadd.xlane.f32.xlu0 %v556_v18  ;;  %v1323_v18 = vadd.f32 %v2519_v39, %v2569_v45  ;;  %v987_v39 = vmul.f32 %v2671_v43, %v2669_v56 }
 0x233   : > { %567 = vadd.xlane.f32.xlu1 %v557_v25  ;;  %v985_v25 = vmul.f32 %v2661_v6, %v2669_v56  ;;  %v1538_v6 = vmul.f32 0.2, %v1530_v4 }
 0x236   : > { %569 = vadd.xlane.f32.xlu0 %v558_v21  ;;  %v1536_v21 = vmul.f32 0.2, %v1528_v57 }
 0x237   : > { %571 = vadd.xlane.f32.xlu1 %v559_v5 }
 0x238   : > { %v1544_v45 = vmax.f32 %v1528_v57, %v1536_v21  ;;  %v3160_v57 = vld [vmem:[#allocation12_spill] sm:$0xff] }
 0x23a   : > { %573 = vadd.xlane.f32.xlu0 %v560_v50  ;;  %v1337_v50 = vmax.f32 %v1321_v58, %v1329_v24  ;;  %v2747_v52 = vadd.f32 %v1544_v45, %v2366_v46  ;;  %v1547_v58 = vmax.f32 %v1531_v37, %v1539_v13  ;;  %v3163_v37 = vld [vmem:[#allocation16_spill] sm:$0xff]  ;;  %v3165_v13 = vld [vmem:[#allocation17_spill] sm:$0xff] }
 0x23b   : > { %575 = vadd.xlane.f32.xlu1 %v561_v7  ;;  %v1331_v7 = vmul.f32 0.2, %v1323_v18 }
 0x23c   : > { %v2743_v43 = vadd.f32 %v1337_v50, %v2403_v19 }
 0x23e   : > { %577 = vadd.xlane.f32.xlu0 %v562_v47  ;;  %v1532_v47 = vadd.f32 %v2714_v10, %v1505_v2  ;;  %v1533_v2 = vadd.f32 %v2714_v10, %v1510_v33 }
 0x23f   : > { %776 = vadd.xlane.f32.xlu1 %v768_v62 }
 0x242   : > { %778 = vadd.xlane.f32.xlu0 %v769_v15  ;;  %v1339_v15 = vmax.f32 %v1323_v18, %v1331_v7 }
 0x243   : > { %780 = vadd.xlane.f32.xlu1 %v770_v17 }
 0x246   : > { %782 = vadd.xlane.f32.xlu0 %v771_v8 }
 0x247   : > { %784 = vadd.xlane.f32.xlu1 %v772_v42  ;;  %v1546_v42 = vmax.f32 %v1530_v4, %v1538_v6 }
 0x249   : > { %v2757_v46 = vadd.f32 %v1546_v42, %v2375_v55 }
 0x24a   : > { %786 = vadd.xlane.f32.xlu0 %v773_v49  ;;  %v1540_v49 = vmul.f32 0.2, %v1532_v47 }
 0x24b   : > { %788 = vadd.xlane.f32.xlu1 %v774_v60  ;;  %v1139_v53 = vpop.xlane.xlu1 %1138  ;;  %v1534_v60 = vadd.f32 %v2714_v10, %v1515_v34 }
 0x24c   : > { %v1548_v41 = vmax.f32 %v1532_v47, %v1540_v49  ;;  %v1153_v33 = vsub.f32 %v2523_v54, %v1139_v53 }
 0x24e   : > { %790 = vadd.xlane.f32.xlu0 %v775_v48  ;;  %v1545_v48 = vmax.f32 %v1529_v1, %v1537_v3  ;;  %v2768_v18 = vadd.f32 %v1548_v41, %v2395_v9  ;;  %v1162_v54 = vmul.f32 1.442695, %v1153_v33 }
 0x24f   : > { %988 = vadd.xlane.f32.xlu1 %v980_v26  ;;  %v1145_v62 = vpop.xlane.xlu1 %1144 }
 0x250   : > { %v2763_v14 = vadd.f32 %v1545_v48, %v2360_v27  ;;  %v2774_v27 = vadd.f32 %v1547_v58, %v2383_v63 }
 0x252   : > { %990 = vadd.xlane.f32.xlu0 %v981_v16  ;;  %v2754_v16 = vadd.f32 %v1339_v15, %v2406_v22 }
 0x253   : > { %992 = vadd.xlane.f32.xlu1 %v982_v51  ;;  %v1149_v26 = vpop.xlane.xlu1 %1148  ;;  %v1542_v51 = vmul.f32 0.2, %v1534_v60 }
 0x254   : > { %v1158_v36 = vsub.f32 %v2533_v30, %v1149_v26 }
 0x255   : > { %v1550_v55 = vmax.f32 %v1534_v60, %v1542_v51 }
 0x256   : > { %994 = vadd.xlane.f32.xlu0 %v983_v20  ;;  %v1541_v20 = vmul.f32 0.2, %v1533_v2  ;;  %v1172_v30 = vmul.f32 1.442695, %v1158_v36 }
 0x257   : > { %996 = vadd.xlane.f32.xlu1 %v984_v61  ;;  %v1137_v0 = vpop.xlane.xlu0 %1136  ;;  %v1156_v61 = vsub.f32 %v3160_v57, %v1145_v62  ;;  %v1349_v24 = vpop.xlane.xlu1 %1348  ;;  %v2778_v9 = vadd.f32 %v1550_v55, %v2423_v44 }
 0x258   : > { %v1152_v17 = vsub.f32 %v2540_v29, %v1137_v0 }
 0x25a   : > { %998 = vadd.xlane.f32.xlu0 %v985_v25  ;;  %v1160_v29 = vmul.f32 1.442695, %v1152_v17  ;;  %v1549_v25 = vmax.f32 %v1533_v2, %v1541_v20 }
 0x25b   : > { %1000 = vadd.xlane.f32.xlu1 %v986_v31  ;;  %v1141_v5 = vpop.xlane.xlu0 %1140  ;;  %v1353_v4 = vpop.xlane.xlu1 %1352 }
 0x25c   : > { %v1154_v38 = vsub.f32 %v2548_v11, %v1141_v5  ;;  %v1535_v11 = vadd.f32 %v2714_v10, %v1520_v32  ;;  %1947 = vpow2.f32 %v1160_v29  ;;  %v1168_v32 = vmul.f32 1.442695, %v1156_v61 }
 0x25d   : > { %v2784_v63 = vadd.f32 %v1549_v25, %v2403_v19  ;;  %v1364_v5 = vsub.f32 %v2537_v59, %v1349_v24  ;;  %v3162_v19 = vld [vmem:[#allocation13_spill] sm:$0xff] }
 0x25e   : > { %1002 = vadd.xlane.f32.xlu0 %v987_v39  ;;  %v1164_v0 = vmul.f32 1.442695, %v1154_v38  ;;  %v1543_v10 = vmul.f32 0.2, %v1535_v11  ;;  %v3161_v39 = vld [vmem:[#allocation15_spill] sm:$0xff]  ;;  %v1366_v6 = vsub.f32 %v3162_v19, %v1353_v4 }
 0x25f   : > { %1360 = vmax.xlane.f32.xlu1 %v2736_v35  ;;  %v1143_v8 = vpop.xlane.xlu0 %1142  ;;  %v1357_v62 = vpop.xlane.xlu1 %1356 }
 0x260   : > { %v1155_v53 = vsub.f32 %v2559_v28, %v1143_v8  ;;  %1949 = vpow2.f32 %v1164_v0  ;;  %v1551_v1 = vmax.f32 %v1535_v11, %v1543_v10  ;;  %v1376_v17 = vmul.f32 1.442695, %v1366_v6  ;;  %v3164_v8 = vld [vmem:[#allocation14_spill] sm:$0xff] }
 0x261   : > { %1951 = vpow2.f32 %v1162_v54  ;;  %v1368_v42 = vsub.f32 %v3164_v8, %v1357_v62 }
 0x262   : > { %1358 = vmax.xlane.f32.xlu0 %v2743_v43  ;;  %v1166_v31 = vmul.f32 1.442695, %v1155_v53  ;;  %1953 = vpow2.f32 %v1168_v32  ;;  %v2794_v47 = vadd.f32 %v1551_v1, %v2406_v22 }
 0x263   : > { %1560 = vmax.xlane.f32.xlu1 %v2747_v52  ;;  %v1147_v34 = vpop.xlane.xlu0 %1146  ;;  %v1380_v26 = vmul.f32 1.442695, %v1368_v42 }
 0x264   : > { %v1157_v28 = vsub.f32 %v2567_v40, %v1147_v34  ;;  %1955 = vpow2.f32 %v1166_v31  ;;  %v1372_v40 = vmul.f32 1.442695, %v1364_v5 }
 0x265   : > { %1957 = vpow2.f32 %v1172_v30 }
 0x266   : > { %1362 = vmax.xlane.f32.xlu0 %v2754_v16  ;;  %v2787_v50 = vpop.eup %1947  ;;  %v1170_v7 = vmul.f32 1.442695, %v1157_v28 }
 0x267   : > { %1564 = vmax.xlane.f32.xlu1 %v2757_v46  ;;  %v1151_v21 = vpop.xlane.xlu0 %1150 }
 0x268   : > { %v1159_v45 = vsub.f32 %v3161_v39, %v1151_v21  ;;  %1959 = vpow2.f32 %v1170_v7 }
 0x269   : > { %1961 = vpow2.f32 %v1372_v40 }
 0x26a   : > { %1562 = vmax.xlane.f32.xlu0 %v2763_v14  ;;  %v2796_v59 = vpop.eup %1949  ;;  %v1174_v3 = vmul.f32 1.442695, %v1159_v45 }
 0x26b   : > { %1568 = vmax.xlane.f32.xlu1 %v2768_v18  ;;  %v1351_v44 = vpop.xlane.xlu0 %1350  ;;  %v2802_v60 = vpop.eup %1951 }
 0x26c   : > { %v1365_v15 = vsub.f32 %v3163_v37, %v1351_v44  ;;  %v2804_v22 = vpop.eup %1953  ;;  %1963 = vpow2.f32 %v1174_v3 }
 0x26d   : > { %1965 = vpow2.f32 %v1376_v17 }
 0x26e   : > { %1566 = vmax.xlane.f32.xlu0 %v2774_v27  ;;  %v1374_v48 = vmul.f32 1.442695, %v1365_v15  ;;  %v2809_v29 = vpop.eup %1955 }
 0x26f   : > { %1572 = vmax.xlane.f32.xlu1 %v2778_v9  ;;  %v1355_v49 = vpop.xlane.xlu0 %1354  ;;  %v2811_v38 = vpop.eup %1957 }
 0x270   : > { %v1367_v2 = vsub.f32 %v3165_v13, %v1355_v49  ;;  %1967 = vpow2.f32 %v1374_v48  ;;  %v2853_v48 = vld [vmem:[%s3120_s3] sm:$0x3f]  ;;  %v3166_v13 = vld [vmem:[#allocation7_spill] sm:$0xff] }
 0x271   : > { %1969 = vpow2.f32 %v1380_v26  ;;  %v2861_v26 = vrot.slane %v2853_v48, %v2251_v12 }
 0x272   : > { %1570 = vmax.xlane.f32.xlu0 %v2784_v63  ;;  %v1378_v41 = vmul.f32 1.442695, %v1367_v2  ;;  %v2815_v51 = vpop.eup %1959  ;;  %v2857_v2 = vrot.slane %v2853_v48, %v3166_v13 }
 0x273   : > { %1176 = vadd.xlane.f32.xlu1 %v2787_v50  ;;  %v2817_v34 = vpop.eup %1961 }
 0x274   : > { %1971 = vpow2.f32 %v1378_v41 }
 0x276   : > { %1574 = vmax.xlane.f32.xlu0 %v2794_v47  ;;  %v2821_v58 = vpop.eup %1963 }
 0x277   : > { %1180 = vadd.xlane.f32.xlu1 %v2796_v59  ;;  %v2823_v20 = vpop.eup %1965 }
 0x27a   : > { %1178 = vadd.xlane.f32.xlu0 %v2802_v60  ;;  %v2827_v33 = vpop.eup %1967 }
 0x27b   : > { %1184 = vadd.xlane.f32.xlu1 %v2804_v22  ;;  %v2829_v11 = vpop.eup %1969 }
 0x27e   : > { %1182 = vadd.xlane.f32.xlu0 %v2809_v29  ;;  %v2833_v0 = vpop.eup %1971 }
 0x27f   : > { %1188 = vadd.xlane.f32.xlu1 %v2811_v38  ;;  %v536_v61 = vpop.xlane.xlu0 %535 }
 0x282   : > { %1186 = vadd.xlane.f32.xlu0 %v2815_v51 }
 0x283   : > { %1388 = vadd.xlane.f32.xlu1 %v2817_v34  ;;  %v534_v57 = vpop.xlane.xlu1 %533 }
 0x284   : > { %1973 = vrcp.f32 %v534_v57 }
 0x286   : > { %1190 = vadd.xlane.f32.xlu0 %v2821_v58 }
 0x287   : > { %1392 = vadd.xlane.f32.xlu1 %v2823_v20  ;;  %v538_v55 = vpop.xlane.xlu1 %537 }
 0x28a   : > { %1390 = vadd.xlane.f32.xlu0 %v2827_v33 }
 0x28b   : > { %1396 = vadd.xlane.f32.xlu1 %v2829_v11  ;;  %v540_v24 = vpop.xlane.xlu0 %539 }
 0x28e   : > { %1394 = vadd.xlane.f32.xlu0 %v2833_v0  ;;  %v1974_v49 = vpop.eup %1973 }
 0x28f   : > { %v542_v25 = vpop.xlane.xlu1 %541 }
 0x293   : > { %v544_v54 = vpop.xlane.xlu0 %543 }
 0x297   : > { %v548_v53 = vpop.xlane.xlu0 %547  ;;  %v546_v10 = vpop.xlane.xlu1 %545 }
 0x29b   : > { %v755_v32 = vpop.xlane.xlu0 %754  ;;  %v753_v36 = vpop.xlane.xlu1 %752 }
 0x29c   : > { %1975 = vrcp.f32 %v753_v36 }
 0x29d   : > { %1977 = vrcp.f32 %v536_v61 }
 0x29e   : > { %1979 = vrcp.f32 %v538_v55 }
 0x29f   : > { %v759_v21 = vpop.xlane.xlu0 %758  ;;  %1981 = vrcp.f32 %v755_v32 }
 0x2a0   : > { %v757_v4 = vpop.xlane.xlu1 %756 }
 0x2a1   : > { %1983 = vrcp.f32 %v757_v4 }
 0x2a2   : > { %1985 = vrcp.f32 %v540_v24 }
 0x2a3   : > { %v763_v31 = vpop.xlane.xlu0 %762  ;;  %1987 = vrcp.f32 %v542_v25 }
 0x2a4   : > { %v761_v28 = vpop.xlane.xlu1 %760  ;;  %1989 = vrcp.f32 %v759_v21 }
 0x2a5   : > { %1991 = vrcp.f32 %v761_v28 }
 0x2a6   : > { %1993 = vrcp.f32 %v544_v54  ;;  %v1976_v61 = vpop.eup %1975 }
 0x2a7   : > { %v767_v30 = vpop.xlane.xlu0 %766  ;;  %1995 = vrcp.f32 %v546_v10  ;;  %v1978_v24 = vpop.eup %1977 }
 0x2a8   : > { %v765_v1 = vpop.xlane.xlu1 %764  ;;  %1997 = vrcp.f32 %v763_v31  ;;  %v1980_v32 = vpop.eup %1979 }
 0x2a9   : > { %1999 = vrcp.f32 %v765_v1  ;;  %v1982_v21 = vpop.eup %1981 }
 0x2aa   : > { %2001 = vrcp.f32 %v548_v53 }
 0x2ab   : > { %v1984_v12 = vpop.eup %1983  ;;  %2003 = vrcp.f32 %v767_v30 }
 0x2ac   : > { %v965_v5 = vpop.xlane.xlu1 %964  ;;  %v2836_v44 = vpop.xlane.xlu0 %966 }
 0x2ad   : > { %v1986_v23 = vpop.eup %1985  ;;  %2005 = vrcp.f32 %v965_v5 }
 0x2ae   : > { %2007 = vrcp.f32 %v2836_v44 }
 0x2b0   : > { %v2838_v7 = vpop.xlane.xlu1 %968 }
 0x2b1   : > { %2009 = vrcp.f32 %v2838_v7 }
 0x2b3   : > { %v2840_v39 = vpop.xlane.xlu0 %970 }
 0x2b4   : > { %v2842_v45 = vpop.xlane.xlu1 %972  ;;  %2011 = vrcp.f32 %v2840_v39 }
 0x2b5   : > { %2013 = vrcp.f32 %v2842_v45 }
 0x2b7   : > { %v2844_v40 = vpop.xlane.xlu0 %974 }
 0x2b8   : > { %v2846_v19 = vpop.xlane.xlu1 %976  ;;  %2015 = vrcp.f32 %v2844_v40 }
 0x2b9   : > { %2017 = vrcp.f32 %v2846_v19 }
 0x2bb   : > { %v2848_v6 = vpop.xlane.xlu0 %978 }
 0x2bc   : > { %v564_v62 = vpop.xlane.xlu1 %563 }
 0x2bd   : > { %v587_v41 = vmul.f32 %v1974_v49, %v564_v62 }
 0x2bf   : > { %v566_v3 = vpop.xlane.xlu0 %565  ;;  %v599_v4 = vmul.f32 %v2861_v26, %v587_v41 }
 0x2c0   : > { %v568_v37 = vpop.xlane.xlu1 %567  ;;  %v588_v36 = vmul.f32 %v1978_v24, %v566_v3 }
 0x2c1   : > { %v589_v54 = vmul.f32 %v1980_v32, %v568_v37 }
 0x2c2   : > { %v600_v1 = vmul.f32 %v2861_v26, %v588_v36 }
 0x2c3   : > { %v570_v15 = vpop.xlane.xlu0 %569  ;;  %v601_v37 = vmul.f32 %v2861_v26, %v589_v54 }
 0x2c4   : > { %v572_v17 = vpop.xlane.xlu1 %571  ;;  %v590_v3 = vmul.f32 %v1986_v23, %v570_v15 }
 0x2c6   : > { %v602_v23 = vmul.f32 %v2861_v26, %v590_v3 }
 0x2c7   : > { %v574_v8 = vpop.xlane.xlu0 %573 }
 0x2c8   : > { %v576_v42 = vpop.xlane.xlu1 %575 }
 0x2cb   : > { %v578_v57 = vpop.xlane.xlu0 %577 }
 0x2cc   : > { %v777_v55 = vpop.xlane.xlu1 %776 }
 0x2cd   : > { %v800_v25 = vmul.f32 %v1976_v61, %v777_v55  ;;  %v1988_v61 = vpop.eup %1987  ;;  %2019 = vrcp.f32 %v2848_v6 }
 0x2ce   : > { %v1990_v41 = vpop.eup %1989  ;;  %v591_v55 = vmul.f32 %v1988_v61, %v572_v17 }
 0x2cf   : > { %v812_v28 = vmul.f32 %v2857_v2, %v800_v25  ;;  %v779_v13 = vpop.xlane.xlu0 %778  ;;  %v1992_v32 = vpop.eup %1991 }
 0x2d0   : > { %v801_v62 = vmul.f32 %v1982_v21, %v779_v13  ;;  %v781_v49 = vpop.xlane.xlu1 %780  ;;  %v603_v13 = vmul.f32 %v2861_v26, %v591_v55 }
 0x2d1   : > { %v2865_v10 = vadd.f32 %v812_v28, %v599_v4  ;;  %v802_v31 = vmul.f32 %v1984_v12, %v781_v49  ;;  %v1994_v28 = vpop.eup %1993 }
 0x2d2   : > { %v813_v53 = vmul.f32 %v2857_v2, %v801_v62  ;;  %v1996_v36 = vpop.eup %1995  ;;  %v592_v15 = vmul.f32 %v1994_v28, %v574_v8 }
 0x2d3   : > { %v814_v24 = vmul.f32 %v2857_v2, %v802_v31  ;;  %v783_v25 = vpop.xlane.xlu0 %782  ;;  %v1998_v54 = vpop.eup %1997  ;;  %v593_v62 = vmul.f32 %v1996_v36, %v576_v42 }
 0x2d4   : > { %v821_v21 = vadd.f32 %v813_v53, %v600_v1  ;;  %v803_v30 = vmul.f32 %v1990_v41, %v783_v25  ;;  %v785_v4 = vpop.xlane.xlu1 %784  ;;  %v2000_v61 = vpop.eup %1999  ;;  %v604_v8 = vmul.f32 %v2861_v26, %v592_v15 }
 0x2d5   : > { %v822_v12 = vadd.f32 %v814_v24, %v601_v37  ;;  %v804_v5 = vmul.f32 %v1992_v32, %v785_v4  ;;  %v2002_v41 = vpop.eup %2001  ;;  %v3167_v24 = vld [vmem:[#allocation9_spill] sm:$0xff]  ;;  %v605_v32 = vmul.f32 %v2861_v26, %v593_v62 }
 0x2d6   : > { %v815_v17 = vmul.f32 %v2857_v2, %v803_v30  ;;  %v594_v3 = vmul.f32 %v2002_v41, %v578_v57  ;;  %v2004_v42 = vpop.eup %2003  ;;  %v1023_v25 = vrot.slane %v2853_v48, %v3167_v24 }
 0x2d7   : > { %v816_v49 = vmul.f32 %v2857_v2, %v804_v5  ;;  %v787_v31 = vpop.xlane.xlu0 %786  ;;  %v2006_v28 = vpop.eup %2005 }
 0x2d8   : > { %v823_v1 = vadd.f32 %v815_v17, %v602_v23  ;;  %v805_v44 = vmul.f32 %v1998_v54, %v787_v31  ;;  %v789_v53 = vpop.xlane.xlu1 %788  ;;  %v606_v57 = vmul.f32 %v2861_v26, %v594_v3  ;;  %v2008_v17 = vpop.eup %2007 }
 0x2d9   : > { %v824_v7 = vadd.f32 %v816_v49, %v603_v13  ;;  %v806_v37 = vmul.f32 %v2000_v61, %v789_v53  ;;  %v2010_v62 = vpop.eup %2009 }
 0x2da   : > { %v817_v55 = vmul.f32 %v2857_v2, %v805_v44  ;;  %v2012_v41 = vpop.eup %2011 }
 0x2db   : > { %v818_v30 = vmul.f32 %v2857_v2, %v806_v37  ;;  %v791_v4 = vpop.xlane.xlu0 %790  ;;  %v2014_v26 = vpop.eup %2013 }
 0x2dc   : > { %v825_v39 = vadd.f32 %v817_v55, %v604_v8  ;;  %v807_v5 = vmul.f32 %v2004_v42, %v791_v4  ;;  %v989_v36 = vpop.xlane.xlu1 %988 }
 0x2dd   : > { %v826_v45 = vadd.f32 %v818_v30, %v605_v32  ;;  %v1012_v23 = vmul.f32 %v2006_v28, %v989_v36  ;;  %v2016_v32 = vpop.eup %2015 }
 0x2de   : > { %v819_v15 = vmul.f32 %v2857_v2, %v807_v5  ;;  %v2018_v4 = vpop.eup %2017 }
 0x2df   : > { %v1024_v54 = vmul.f32 %v1023_v25, %v1012_v23  ;;  %v991_v13 = vpop.xlane.xlu0 %990 }
 0x2e0   : > { %v827_v49 = vadd.f32 %v819_v15, %v606_v57  ;;  %v1013_v31 = vmul.f32 %v2008_v17, %v991_v13  ;;  %v993_v61 = vpop.xlane.xlu1 %992 }
 0x2e1   : > { %v2891_v44 = vadd.f32 %v1024_v54, %v2865_v10  ;;  %v1014_v40 = vmul.f32 %v2010_v62, %v993_v61 }
 0x2e2   : > { %v1025_v53 = vmul.f32 %v1023_v25, %v1013_v31 }
 0x2e3   : > { %v1026_v19 = vmul.f32 %v1023_v25, %v1014_v40  ;;  %v995_v37 = vpop.xlane.xlu0 %994 }
 0x2e4   : > { %v2893_v8 = vadd.f32 %v1025_v53, %v821_v21  ;;  %v1015_v2 = vmul.f32 %v2012_v41, %v995_v37  ;;  %v997_v3 = vpop.xlane.xlu1 %996  ;;  %v2020_v21 = vpop.eup %2019 }
 0x2e5   : > { %v2895_v55 = vadd.f32 %v1026_v19, %v822_v12  ;;  %v1016_v42 = vmul.f32 %v2014_v26, %v997_v3 }
 0x2e6   : > { %v1027_v24 = vmul.f32 %v1023_v25, %v1015_v2 }
 0x2e7   : > { %v1028_v30 = vmul.f32 %v1023_v25, %v1016_v42  ;;  %v999_v6 = vpop.xlane.xlu0 %998 }
 0x2e8   : > { %v2897_v10 = vadd.f32 %v1027_v24, %v823_v1  ;;  %v1017_v28 = vmul.f32 %v2016_v32, %v999_v6  ;;  %v1001_v5 = vpop.xlane.xlu1 %1000 }
 0x2e9   : > { %v2899_v36 = vadd.f32 %v1028_v30, %v824_v7  ;;  %v1018_v23 = vmul.f32 %v2018_v4, %v1001_v5 }
 0x2ea   : > { %v1029_v57 = vmul.f32 %v1023_v25, %v1017_v28 }
 0x2eb   : > { %v1030_v15 = vmul.f32 %v1023_v25, %v1018_v23  ;;  %v1003_v17 = vpop.xlane.xlu0 %1002 }
 0x2ec   : > { %v2901_v54 = vadd.f32 %v1029_v57, %v825_v39  ;;  %v1019_v12 = vmul.f32 %v2020_v21, %v1003_v17  ;;  %v1361_v13 = vpop.xlane.xlu1 %1360 }
 0x2ed   : > { %v2903_v62 = vadd.f32 %v1030_v15, %v826_v45  ;;  %v1370_v31 = vsub.f32 %v2736_v35, %v1361_v13 }
 0x2ee   : > { %v1031_v61 = vmul.f32 %v1023_v25, %v1019_v12 }
 0x2ef   : > { %v1384_v1 = vmul.f32 1.442695, %v1370_v31  ;;  %v1359_v40 = vpop.xlane.xlu0 %1358 }
 0x2f0   : > { %v2906_v53 = vadd.f32 %v1031_v61, %v827_v49  ;;  %v1369_v7 = vsub.f32 %v2743_v43, %v1359_v40  ;;  %v1561_v41 = vpop.xlane.xlu1 %1560  ;;  %v1192_v40 = vmul.f32 %v2787_v50, %v2669_v56  ;;  %v1198_v50 = vmul.f32 %v2811_v38, %v2669_v56 }
 0x2f1   : > { %2021 = vpow2.f32 %v1384_v1  ;;  %v1576_v19 = vsub.f32 %v2747_v52, %v1561_v41  ;;  %v1193_v41 = vmul.f32 %v2802_v60, %v2669_v56  ;;  %v1199_v60 = vmul.f32 %v2821_v58, %v2669_v56 }
 0x2f2   : > { %v1382_v37 = vmul.f32 1.442695, %v1369_v7  ;;  %v1408_v38 = vmul.f32 %v2829_v11, %v2669_v56 }
 0x2f3   : > { %v1584_v39 = vmul.f32 1.442695, %v1576_v19  ;;  %v1363_v26 = vpop.xlane.xlu0 %1362  ;;  %v1196_v19 = vmul.f32 %v2804_v22, %v2669_v56  ;;  %v1406_v22 = vmul.f32 %v2823_v20, %v2669_v56 }
 0x2f4   : > { %2023 = vpow2.f32 %v1382_v37  ;;  %v1371_v45 = vsub.f32 %v2754_v16, %v1363_v26  ;;  %v1565_v2 = vpop.xlane.xlu1 %1564  ;;  %v1195_v37 = vmul.f32 %v2809_v29, %v2669_v56  ;;  %v1405_v29 = vmul.f32 %v2827_v33, %v2669_v56 }
 0x2f5   : > { %2025 = vpow2.f32 %v1584_v39  ;;  %v1578_v35 = vsub.f32 %v2757_v46, %v1565_v2  ;;  %v1404_v39 = vmul.f32 %v2817_v34, %v2669_v56 }
 0x2f6   : > { %v1386_v25 = vmul.f32 1.442695, %v1371_v45 }
 0x2f7   : > { %v1588_v3 = vmul.f32 1.442695, %v1578_v35  ;;  %v1563_v49 = vpop.xlane.xlu0 %1562 }
 0x2f8   : > { %2027 = vpow2.f32 %v1386_v25  ;;  %v1577_v43 = vsub.f32 %v2763_v14, %v1563_v49  ;;  %v1569_v42 = vpop.xlane.xlu1 %1568 }
 0x2f9   : > { %2029 = vpow2.f32 %v1588_v3  ;;  %v1580_v52 = vsub.f32 %v2768_v18, %v1569_v42 }
 0x2fa   : > { %v1586_v24 = vmul.f32 1.442695, %v1577_v43 }
 0x2fb   : > { %v2914_v32 = vpop.eup %2021  ;;  %v1592_v30 = vmul.f32 1.442695, %v1580_v52  ;;  %v1567_v6 = vpop.xlane.xlu0 %1566 }
 0x2fc   : > { %2031 = vpow2.f32 %v1586_v24  ;;  %v1579_v16 = vsub.f32 %v2774_v27, %v1567_v6  ;;  %1400 = vadd.xlane.f32.xlu1 %v2914_v32  ;;  %v1573_v46 = vpop.xlane.xlu1 %1572  ;;  %v1410_v34 = vmul.f32 %v2914_v32, %v2669_v56 }
 0x2fd   : > { %2033 = vpow2.f32 %v1592_v30  ;;  %v1582_v4 = vsub.f32 %v2778_v9, %v1573_v46 }
 0x2fe   : > { %v2024_v28 = vpop.eup %2023  ;;  %v1590_v14 = vmul.f32 1.442695, %v1579_v16 }
 0x2ff   : > { %v2026_v5 = vpop.eup %2025  ;;  %v1596_v23 = vmul.f32 1.442695, %v1582_v4  ;;  %v1571_v57 = vpop.xlane.xlu0 %1570  ;;  %1398 = vadd.xlane.f32.xlu0 %v2024_v28  ;;  %v1409_v58 = vmul.f32 %v2024_v28, %v2669_v56 }
 0x300   : > { %2035 = vpow2.f32 %v1590_v14  ;;  %v1581_v18 = vsub.f32 %v2784_v63, %v1571_v57  ;;  %1600 = vadd.xlane.f32.xlu1 %v2026_v5  ;;  %v1616_v20 = vmul.f32 %v2026_v5, %v2669_v56  ;;  %v1177_v3 = vpop.xlane.xlu1 %1176 }
 0x301   : > { %2037 = vpow2.f32 %v1596_v23 }
 0x302   : > { %v2028_v21 = vpop.eup %2027  ;;  %v1594_v15 = vmul.f32 1.442695, %v1581_v18 }
 0x303   : > { %v2030_v27 = vpop.eup %2029  ;;  %v1575_v17 = vpop.xlane.xlu0 %1574  ;;  %1402 = vadd.xlane.f32.xlu0 %v2028_v21  ;;  %v1411_v33 = vmul.f32 %v2028_v21, %v2669_v56 }
 0x304   : > { %2039 = vpow2.f32 %v1594_v15  ;;  %v1583_v12 = vsub.f32 %v2794_v47, %v1575_v17  ;;  %1604 = vadd.xlane.f32.xlu1 %v2030_v27  ;;  %v1194_v47 = vmul.f32 %v2796_v59, %v2669_v56  ;;  %v1197_v59 = vmul.f32 %v2815_v51, %v2669_v56  ;;  %v1181_v49 = vpop.xlane.xlu1 %1180  ;;  %v3168_v17 = vld [vmem:[#allocation10_spill] sm:$0xff] }
 0x305   : > { %v1407_v51 = vmul.f32 %v2833_v0, %v2669_v56  ;;  %v1618_v11 = vmul.f32 %v2030_v27, %v2669_v56 }
 0x306   : > { %v2032_v9 = vpop.eup %2031  ;;  %v1598_v13 = vmul.f32 1.442695, %v1583_v12  ;;  %v1235_v12 = vrot.slane %v2853_v48, %v3168_v17 }
 0x307   : > { %v2034_v31 = vpop.eup %2033  ;;  %1602 = vadd.xlane.f32.xlu0 %v2032_v9  ;;  %v1617_v26 = vmul.f32 %v2032_v9, %v2669_v56  ;;  %v1179_v43 = vpop.xlane.xlu0 %1178 }
 0x308   : > { %2041 = vpow2.f32 %v1598_v13  ;;  %1608 = vadd.xlane.f32.xlu1 %v2034_v31  ;;  %v1620_v0 = vmul.f32 %v2034_v31, %v2669_v56  ;;  %v1185_v42 = vpop.xlane.xlu1 %1184 }
 0x309   : > { %2043 = vrcp.f32 %v1177_v3 }
 0x30a   : > { %v2036_v61 = vpop.eup %2035  ;;  %2045 = vrcp.f32 %v1181_v49 }
 0x30b   : > { %v2038_v1 = vpop.eup %2037  ;;  %1606 = vadd.xlane.f32.xlu0 %v2036_v61  ;;  %v1619_v45 = vmul.f32 %v2036_v61, %v2669_v56  ;;  %v1183_v52 = vpop.xlane.xlu0 %1182  ;;  %2047 = vrcp.f32 %v1179_v43 }
 0x30c   : > { %1612 = vadd.xlane.f32.xlu1 %v2038_v1  ;;  %v1622_v2 = vmul.f32 %v2038_v1, %v2669_v56  ;;  %v1189_v24 = vpop.xlane.xlu1 %1188  ;;  %2049 = vrcp.f32 %v1185_v42 }
 0x30d   : > { %2051 = vrcp.f32 %v1183_v52 }
 0x30e   : > { %v2040_v63 = vpop.eup %2039  ;;  %2053 = vrcp.f32 %v1189_v24 }
 0x30f   : > { %1610 = vadd.xlane.f32.xlu0 %v2040_v63  ;;  %v1621_v35 = vmul.f32 %v2040_v63, %v2669_v56  ;;  %v1187_v32 = vpop.xlane.xlu0 %1186 }
 0x310   : > { %1200 = vadd.xlane.f32.xlu1 %v1192_v40  ;;  %v1389_v30 = vpop.xlane.xlu1 %1388  ;;  %2055 = vrcp.f32 %v1187_v32 }
 0x312   : > { %v2042_v7 = vpop.eup %2041 }
 0x313   : > { %1614 = vadd.xlane.f32.xlu0 %v2042_v7  ;;  %v1623_v25 = vmul.f32 %v2042_v7, %v2669_v56  ;;  %v1191_v6 = vpop.xlane.xlu0 %1190  ;;  %v2044_v13 = vpop.eup %2043 }
 0x314   : > { %1204 = vadd.xlane.f32.xlu1 %v1194_v47  ;;  %v1393_v16 = vpop.xlane.xlu1 %1392  ;;  %v2046_v40 = vpop.eup %2045  ;;  %2057 = vrcp.f32 %v1191_v6 }
 0x315   : > { %2059 = vrcp.f32 %v1389_v30 }
 0x316   : > { %2061 = vrcp.f32 %v1393_v16 }
 0x317   : > { %1202 = vadd.xlane.f32.xlu0 %v1193_v41  ;;  %v2959_v46 = vpop.xlane.xlu0 %1390 }
 0x318   : > { %1208 = vadd.xlane.f32.xlu1 %v1196_v19  ;;  %v2961_v4 = vpop.xlane.xlu1 %1396  ;;  %v2048_v19 = vpop.eup %2047 }
 0x31b   : > { %1206 = vadd.xlane.f32.xlu0 %v1195_v37  ;;  %v2963_v28 = vpop.xlane.xlu0 %1394 }
 0x31c   : > { %1212 = vadd.xlane.f32.xlu1 %v1198_v50 }
 0x31f   : > { %1210 = vadd.xlane.f32.xlu0 %v1197_v59  ;;  %v2050_v59 = vpop.eup %2049 }
 0x320   : > { %1412 = vadd.xlane.f32.xlu1 %v1404_v39 }
 0x323   : > { %1214 = vadd.xlane.f32.xlu0 %v1199_v60 }
 0x324   : > { %1416 = vadd.xlane.f32.xlu1 %v1406_v22 }
 0x327   : > { %1414 = vadd.xlane.f32.xlu0 %v1405_v29 }
 0x328   : > { %1420 = vadd.xlane.f32.xlu1 %v1408_v38 }
 0x32b   : > { %1418 = vadd.xlane.f32.xlu0 %v1407_v51  ;;  %v2052_v51 = vpop.eup %2051 }
 0x32c   : > { %1424 = vadd.xlane.f32.xlu1 %v1410_v34 }
 0x32f   : > { %1422 = vadd.xlane.f32.xlu0 %v1409_v58 }
 0x330   : > { %1624 = vadd.xlane.f32.xlu1 %v1616_v20  ;;  %v2054_v20 = vpop.eup %2053 }
 0x333   : > { %1426 = vadd.xlane.f32.xlu0 %v1411_v33 }
 0x334   : > { %1628 = vadd.xlane.f32.xlu1 %v1618_v11 }
 0x337   : > { %1626 = vadd.xlane.f32.xlu0 %v1617_v26 }
 0x338   : > { %1632 = vadd.xlane.f32.xlu1 %v1620_v0 }
 0x33b   : > { %1630 = vadd.xlane.f32.xlu0 %v1619_v45 }
 0x33c   : > { %1636 = vadd.xlane.f32.xlu1 %v1622_v2  ;;  %v2056_v2 = vpop.eup %2055 }
 0x33d   : > { %v2058_v42 = vpop.eup %2057 }
 0x33e   : > { %v2060_v17 = vpop.eup %2059 }
 0x33f   : > { %1634 = vadd.xlane.f32.xlu0 %v1621_v35 }
 0x343   : > { %1638 = vadd.xlane.f32.xlu0 %v1623_v25 }
 0x389   : > { %v2965_v14 = vpop.xlane.xlu1 %1400 }
 0x38c   : > { %v2967_v56 = vpop.xlane.xlu0 %1398 }
 0x38d   : > { %v1601_v5 = vpop.xlane.xlu1 %1600 }
 0x38e   : > { %2063 = vrcp.f32 %v1601_v5 }
 0x38f   : > { %2065 = vrcp.f32 %v2959_v46 }
 0x390   : > { %v2969_v23 = vpop.xlane.xlu0 %1402  ;;  %2067 = vrcp.f32 %v2961_v4  ;;  %v2062_v4 = vpop.eup %2061 }
 0x391   : > { %v2971_v57 = vpop.xlane.xlu1 %1604  ;;  %2069 = vrcp.f32 %v2963_v28  ;;  %v3170_v28 = vld [vmem:[#allocation8_spill] sm:$0xff] }
 0x392   : > { %2071 = vrcp.f32 %v2971_v57  ;;  %v3027_v57 = vrot.slane %v2853_v48, %v3170_v28 }
 0x393   : > { %2073 = vrcp.f32 %v2965_v14 }
 0x394   : > { %v2973_v18 = vpop.xlane.xlu0 %1602 }
 0x395   : > { %v2975_v21 = vpop.xlane.xlu1 %1608  ;;  %2075 = vrcp.f32 %v2973_v18 }
 0x396   : > { %2077 = vrcp.f32 %v2975_v21 }
 0x397   : > { %2079 = vrcp.f32 %v2967_v56 }
 0x398   : > { %v2977_v15 = vpop.xlane.xlu0 %1606  ;;  %2081 = vrcp.f32 %v2969_v23 }
 0x399   : > { %v2979_v27 = vpop.xlane.xlu1 %1612  ;;  %2083 = vrcp.f32 %v2977_v15 }
 0x39a   : > { %2085 = vrcp.f32 %v2979_v27  ;;  %v3171_v27 = vld [vmem:[#allocation6_spill] sm:$0xff] }
 0x39c   : > { %v2983_v9 = vpop.xlane.xlu0 %1610 }
 0x39d   : > { %v1201_v31 = vpop.xlane.xlu1 %1200  ;;  %2087 = vrcp.f32 %v2983_v9 }
 0x39e   : > { %v1224_v61 = vmul.f32 %v2044_v13, %v1201_v31 }
 0x3a0   : > { %v1236_v1 = vmul.f32 %v1235_v12, %v1224_v61  ;;  %v2985_v63 = vpop.xlane.xlu0 %1614  ;;  %v2064_v61 = vpop.eup %2063 }
 0x3a1   : > { %v1205_v7 = vpop.xlane.xlu1 %1204  ;;  %2089 = vrcp.f32 %v2985_v63 }
 0x3a2   : > { %v2988_v47 = vadd.f32 %v1236_v1, %v2891_v44  ;;  %v1226_v41 = vmul.f32 %v2046_v40, %v1205_v7  ;;  %v2066_v1 = vpop.eup %2065 }
 0x3a3   : > { %v2068_v7 = vpop.eup %2067 }
 0x3a4   : > { %v1238_v37 = vmul.f32 %v1235_v12, %v1226_v41  ;;  %v1203_v50 = vpop.xlane.xlu0 %1202  ;;  %v2070_v41 = vpop.eup %2069 }
 0x3a5   : > { %v1225_v39 = vmul.f32 %v2048_v19, %v1203_v50  ;;  %v1209_v60 = vpop.xlane.xlu1 %1208  ;;  %v2072_v15 = vpop.eup %2071 }
 0x3a6   : > { %v2991_v22 = vadd.f32 %v1238_v37, %v2895_v55  ;;  %v1228_v29 = vmul.f32 %v2050_v59, %v1209_v60 }
 0x3a7   : > { %v1237_v38 = vmul.f32 %v1235_v12, %v1225_v39 }
 0x3a8   : > { %v1240_v34 = vmul.f32 %v1235_v12, %v1228_v29  ;;  %v1207_v58 = vpop.xlane.xlu0 %1206 }
 0x3a9   : > { %v2994_v44 = vadd.f32 %v1237_v38, %v2893_v8  ;;  %v1227_v33 = vmul.f32 %v2052_v51, %v1207_v58  ;;  %v1213_v11 = vpop.xlane.xlu1 %1212  ;;  %v2074_v38 = vpop.eup %2073 }
 0x3aa   : > { %v2997_v26 = vadd.f32 %v1240_v34, %v2899_v36  ;;  %v1230_v0 = vmul.f32 %v2054_v20, %v1213_v11 }
 0x3ab   : > { %v1239_v45 = vmul.f32 %v1235_v12, %v1227_v33  ;;  %v2076_v33 = vpop.eup %2075 }
 0x3ac   : > { %v1242_v35 = vmul.f32 %v1235_v12, %v1230_v0  ;;  %v1211_v55 = vpop.xlane.xlu0 %1210 }
 0x3ad   : > { %v3000_v25 = vadd.f32 %v1239_v45, %v2897_v10  ;;  %v1229_v3 = vmul.f32 %v2056_v2, %v1211_v55  ;;  %v1413_v49 = vpop.xlane.xlu1 %1412  ;;  %v2078_v55 = vpop.eup %2077 }
 0x3ae   : > { %v3003_v43 = vadd.f32 %v1242_v35, %v2903_v62  ;;  %v1436_v5 = vmul.f32 %v2060_v17, %v1413_v49 }
 0x3af   : > { %v1241_v8 = vmul.f32 %v1235_v12, %v1229_v3 }
 0x3b0   : > { %v1215_v52 = vpop.xlane.xlu0 %1214 }
 0x3b1   : > { %v3006_v36 = vadd.f32 %v1241_v8, %v2901_v54  ;;  %v1231_v24 = vmul.f32 %v2058_v42, %v1215_v52  ;;  %v1417_v32 = vpop.xlane.xlu1 %1416  ;;  %v3169_v54 = vld [vmem:[#allocation11_spill] sm:$0xff]  ;;  %v2080_v42 = vpop.eup %2079 }
 0x3b2   : > { %v3017_v16 = vrot.slane %v2853_v48, %v3169_v54  ;;  %v1438_v13 = vmul.f32 %v2062_v4, %v1417_v32  ;;  %v1708_v48 = vld [vmem:[%s3124_s7] sm:$0x1]  ;;  %v2082_v32 = vpop.eup %2081 }
 0x3b3   : > { %v1243_v6 = vmul.f32 %v1235_v12, %v1231_v24  ;;  %v1709_v29 = vmul.f32 0.999995, %v1708_v48  ;;  %v2084_v54 = vpop.eup %2083 }
 0x3b4   : > { %v1415_v10 = vpop.xlane.xlu0 %1414  ;;  %v1448_v14 = vmul.f32 %v3017_v16, %v1436_v5  ;;  %v1450_v37 = vmul.f32 %v3017_v16, %v1438_v13 }
 0x3b5   : > { %v3011_v30 = vadd.f32 %v1243_v6, %v2906_v53  ;;  %v1421_v62 = vpop.xlane.xlu1 %1420  ;;  %v1684_v53 = vld [vmem:[%s3123_s6] sm:$0x1]  ;;  %v1437_v56 = vmul.f32 %v2066_v1, %v1415_v10  ;;  %v3050_v8 = vrot.slane %v1709_v29, %v3171_v27 }
 0x3b6   : > { %v1685_v40 = vmul.f32 0.999995, %v1684_v53  ;;  %v1456_v19 = vadd.f32 %v1448_v14, %v2988_v47  ;;  %v1440_v23 = vmul.f32 %v2068_v7, %v1421_v62  ;;  %v1458_v11 = vadd.f32 %v1450_v37, %v2991_v22  ;;  %v2086_v53 = vpop.eup %2085 }
 0x3b7   : > { %v1449_v47 = vmul.f32 %v3017_v16, %v1437_v56  ;;  %v2088_v56 = vpop.eup %2087 }
 0x3b8   : > { %v1419_v46 = vpop.xlane.xlu0 %1418  ;;  %v3042_v58 = vrot.slane %v1685_v40, %v3171_v27  ;;  %v1452_v0 = vmul.f32 %v3017_v16, %v1440_v23 }
 0x3b9   : > { %v1425_v12 = vpop.xlane.xlu1 %1424  ;;  %v1439_v39 = vmul.f32 %v2070_v41, %v1419_v46  ;;  %v1457_v6 = vadd.f32 %v1449_v47, %v2994_v44  ;;  %v2090_v47 = vpop.eup %2089 }
 0x3ba   : > { %v1442_v20 = vmul.f32 %v2074_v38, %v1425_v12  ;;  %v1460_v5 = vadd.f32 %v1452_v0, %v2997_v26 }
 0x3bb   : > { %v1451_v9 = vmul.f32 %v3017_v16, %v1439_v39 }
 0x3bc   : > { %v1423_v31 = vpop.xlane.xlu0 %1422  ;;  %v1454_v10 = vmul.f32 %v3017_v16, %v1442_v20 }
 0x3bd   : > { %v1625_v18 = vpop.xlane.xlu1 %1624  ;;  %v1441_v62 = vmul.f32 %v2080_v42, %v1423_v31  ;;  %v1459_v28 = vadd.f32 %v1451_v9, %v3000_v25 }
 0x3be   : > { %v1648_v21 = vmul.f32 %v2064_v61, %v1625_v18  ;;  %v1462_v26 = vadd.f32 %v1454_v10, %v3003_v43 }
 0x3bf   : > { %v1453_v40 = vmul.f32 %v3017_v16, %v1441_v62 }
 0x3c0   : > { %v1660_v50 = vmul.f32 %v3027_v57, %v1648_v21  ;;  %v1427_v59 = vpop.xlane.xlu0 %1426 }
 0x3c1   : > { %v1629_v60 = vpop.xlane.xlu1 %1628  ;;  %v1443_v14 = vmul.f32 %v2082_v32, %v1427_v59  ;;  %v1461_v38 = vadd.f32 %v1453_v40, %v3006_v36 }
 0x3c2   : > { %v1668_v51 = vadd.f32 %v1660_v50, %v1456_v19  ;;  %v1650_v34 = vmul.f32 %v2072_v15, %v1629_v60 }
 0x3c3   : > { %v1455_v43 = vmul.f32 %v3017_v16, %v1443_v14 }
 0x3c4   : > { %v1676_v45 = vmul.f32 0.16666584, %v1668_v51  ;;  %v1662_v2 = vmul.f32 %v3027_v57, %v1650_v34  ;;  %v1627_v35 = vpop.xlane.xlu0 %1626 }
 0x3c5   : > { %v1649_v3 = vmul.f32 %v2076_v33, %v1627_v35  ;;  %v1633_v49 = vpop.xlane.xlu1 %1632 }
 0x3c6   : > { %v1670_v52 = vadd.f32 %v1662_v2, %v1458_v11  ;;  %v1652_v22 = vmul.f32 %v2078_v55, %v1633_v49  ;;  %v1692_v24 = vadd.f32 %v3042_v58, %v1676_v45  ;;  %v1463_v55 = vadd.f32 %v1455_v43, %v3011_v30 }
 0x3c7   : > { %v1661_v17 = vmul.f32 %v3027_v57, %v1649_v3 }
 0x3c8   : > { %v1678_v46 = vmul.f32 0.16666584, %v1670_v52  ;;  %v1664_v12 = vmul.f32 %v3027_v57, %v1652_v22  ;;  %v1631_v4 = vpop.xlane.xlu0 %1630  ;;  %v1700_v63 = vmax.f32 %v1692_v24, 0.0 }
 0x3c9   : > { %v1669_v13 = vadd.f32 %v1661_v17, %v1457_v6  ;;  %v1651_v61 = vmul.f32 %v2084_v54, %v1631_v4  ;;  %v1637_v44 = vpop.xlane.xlu1 %1636 }
 0x3ca   : > { %v1672_v18 = vadd.f32 %v1664_v12, %v1460_v5  ;;  %v1654_v1 = vmul.f32 %v2086_v53, %v1637_v44  ;;  %v1716_v31 = vmul.f32 %v3050_v8, %v1700_v63  ;;  %v1694_v21 = vadd.f32 %v3042_v58, %v1678_v46 }
 0x3cb   : > { %v1677_v48 = vmul.f32 0.16666584, %v1669_v13  ;;  %v1663_v7 = vmul.f32 %v3027_v57, %v1651_v61 }
 0x3cc   : > { %v1680_v41 = vmul.f32 0.16666584, %v1672_v18  ;;  %v1666_v25 = vmul.f32 %v3027_v57, %v1654_v1  ;;  %v1635_v19 = vpop.xlane.xlu0 %1634  ;;  %v1725_v37 = vsel %vm1724_vm1, %v1716_v31, 0.0  ;;  %v1702_v23 = vmax.f32 %v1694_v21, 0.0 }
 0x3cd   : > { %v1671_v50 = vadd.f32 %v1663_v7, %v1459_v28  ;;  %v1653_v59 = vmul.f32 %v2088_v56, %v1635_v19  ;;  %1726 = vadd.xlane.f32.xlu1 %v1725_v37  ;;  %v1693_v15 = vadd.f32 %v3042_v58, %v1677_v48  ;;  %v1874_v28 = vld [vmem:[#allocation2] ss:$0 sm:$0xff] }
 0x3ce   : > { %v1674_v39 = vadd.f32 %v1666_v25, %v1462_v26  ;;  %v1718_v60 = vmul.f32 %v3050_v8, %v1702_v23  ;;  %v1696_v29 = vadd.f32 %v3042_v58, %v1680_v41 }
 0x3cf   : > { %v1679_v51 = vmul.f32 0.16666584, %v1671_v50  ;;  %v1665_v34 = vmul.f32 %v3027_v57, %v1653_v59  ;;  %v1701_v27 = vmax.f32 %v1693_v15, 0.0 }
 0x3d0   : > { %v1682_v20 = vmul.f32 0.16666584, %v1674_v39  ;;  %v1639_v33 = vpop.xlane.xlu0 %1638  ;;  %v1731_v11 = vsel %vm1724_vm1, %v1718_v60, 0.0  ;;  %v1704_v0 = vmax.f32 %v1696_v29, 0.0 }
 0x3d1   : > { %v1673_v45 = vadd.f32 %v1665_v34, %v1461_v38  ;;  %v1655_v2 = vmul.f32 %v2090_v47, %v1639_v33  ;;  %1732 = vadd.xlane.f32.xlu1 %v1731_v11  ;;  %v1717_v16 = vmul.f32 %v3050_v8, %v1701_v27  ;;  %v1695_v35 = vadd.f32 %v3042_v58, %v1679_v51 }
 0x3d2   : > { %v1720_v36 = vmul.f32 %v3050_v8, %v1704_v0  ;;  %v1698_v9 = vadd.f32 %v3042_v58, %v1682_v20 }
 0x3d3   : > { %v1681_v3 = vmul.f32 0.16666584, %v1673_v45  ;;  %v1667_v49 = vmul.f32 %v3027_v57, %v1655_v2  ;;  %v1728_v42 = vsel %vm1724_vm1, %v1717_v16, 0.0  ;;  %v1703_v52 = vmax.f32 %v1695_v35, 0.0 }
 0x3d4   : > { %1729 = vadd.xlane.f32.xlu0 %v1728_v42  ;;  %v1737_v22 = vsel %vm1724_vm1, %v1720_v36, 0.0  ;;  %v1706_v24 = vmax.f32 %v1698_v9, 0.0 }
 0x3d5   : > { %v1675_v32 = vadd.f32 %v1667_v49, %v1463_v55  ;;  %1738 = vadd.xlane.f32.xlu1 %v1737_v22  ;;  %v1719_v6 = vmul.f32 %v3050_v8, %v1703_v52  ;;  %v1697_v30 = vadd.f32 %v3042_v58, %v1681_v3 }
 0x3d6   : > { %v1722_v10 = vmul.f32 %v3050_v8, %v1706_v24 }
 0x3d7   : > { %v1683_v62 = vmul.f32 0.16666584, %v1675_v32  ;;  %v1734_v17 = vsel %vm1724_vm1, %v1719_v6, 0.0  ;;  %v1705_v57 = vmax.f32 %v1697_v30, 0.0 }
 0x3d8   : > { %1735 = vadd.xlane.f32.xlu0 %v1734_v17  ;;  %v1743_v54 = vsel %vm1724_vm1, %v1722_v10, 0.0 }
 0x3d9   : > { %1744 = vadd.xlane.f32.xlu1 %v1743_v54  ;;  %v1721_v5 = vmul.f32 %v3050_v8, %v1705_v57  ;;  %v1699_v46 = vadd.f32 %v3042_v58, %v1683_v62 }
 0x3db   : > { %v1740_v12 = vsel %vm1724_vm1, %v1721_v5, 0.0  ;;  %v1707_v4 = vmax.f32 %v1699_v46, 0.0 }
 0x3dc   : > { %1741 = vadd.xlane.f32.xlu0 %v1740_v12 }
 0x3dd   : > { %v1723_v63 = vmul.f32 %v3050_v8, %v1707_v4 }
 0x3df   : > { %v1746_v53 = vsel %vm1724_vm1, %v1723_v63, 0.0 }
 0x3e0   : > { %1747 = vadd.xlane.f32.xlu0 %v1746_v53 }
 0x45a   : > { %v1727_v14 = vpop.xlane.xlu1 %1726 }
 0x45b   : > { %v1756_v13 = vadd.f32 %v1874_v28, %v1727_v14 }
 0x45d   : > { %v1764_v58 = vmax.f32 %v1756_v13, 0.0 }
 0x45e   : > { %v1733_v61 = vpop.xlane.xlu1 %1732 }
 0x45f   : > { %1773 = vst.msk [vmem:[%s3096_s28] sm:$0xff] %vm1772_vm2, %v1764_v58  ;;  %v1758_v8 = vadd.f32 %v1874_v28, %v1733_v61 }
 0x461   : > { %v1766_v44 = vmax.f32 %v1758_v8, 0.0  ;;  %v1730_v18 = vpop.xlane.xlu0 %1729 }
 0x462   : > { %v1757_v1 = vadd.f32 %v1874_v28, %v1730_v18  ;;  %v1739_v31 = vpop.xlane.xlu1 %1738 }
 0x463   : > { %1775 = vst.msk [vmem:[%s3096_s28 + $0x10] sm:$0xff] %vm1772_vm2, %v1766_v44  ;;  %v1760_v21 = vadd.f32 %v1874_v28, %v1739_v31 }
 0x464   : > { %v1765_v26 = vmax.f32 %v1757_v1, 0.0 }
 0x465   : > { %v1768_v40 = vmax.f32 %v1760_v21, 0.0  ;;  %v1736_v48 = vpop.xlane.xlu0 %1735 }
 0x466   : > { %1774 = vst.msk [vmem:[%s3096_s28 + $0x8] sm:$0xff] %vm1772_vm2, %v1765_v26  ;;  %v1759_v7 = vadd.f32 %v1874_v28, %v1736_v48  ;;  %v1745_v56 = vpop.xlane.xlu1 %1744 }
 0x467   : > { %1777 = vst.msk [vmem:[%s3096_s28 + $0x20] sm:$0xff] %vm1772_vm2, %v1768_v40  ;;  %v1762_v41 = vadd.f32 %v1874_v28, %v1745_v56 }
 0x468   : > { %v1767_v25 = vmax.f32 %v1759_v7, 0.0 }
 0x469   : > { %v1770_v19 = vmax.f32 %v1762_v41, 0.0  ;;  %v1742_v37 = vpop.xlane.xlu0 %1741 }
 0x46a   : > { %1776 = vst.msk [vmem:[%s3096_s28 + $0x18] sm:$0xff] %vm1772_vm2, %v1767_v25  ;;  %v1761_v23 = vadd.f32 %v1874_v28, %v1742_v37 }
 0x46b   : > { %1779 = vst.msk [vmem:[%s3096_s28 + $0x30] sm:$0xff] %vm1772_vm2, %v1770_v19 }
 0x46c   : > { %v1769_v50 = vmax.f32 %v1761_v23, 0.0 }
 0x46d   : > { %v1748_v59 = vpop.xlane.xlu0 %1747 }
 0x46e   : > { %1778 = vst.msk [vmem:[%s3096_s28 + $0x28] sm:$0xff] %vm1772_vm2, %v1769_v50  ;;  %v1763_v15 = vadd.f32 %v1874_v28, %v1748_v59 }
 0x470   : > { %v1771_v43 = vmax.f32 %v1763_v15, 0.0 }
 0x472   : > { %1780 = vst.msk [vmem:[%s3096_s28 + $0x38] sm:$0xff] %vm1772_vm2, %v1771_v43 }
 0x473 PF: > { %s22_s11 = sadd.s32 1, %s2130_s11  }
 0x474   : > { %p19_p3 = scmp.ge.s32.totalorder %s22_s11, 4  }
 0x476   :  { %21 = sbr.rel (!%p19_p3) target bundleno = 4 (0x4), region = 94 }
 0x47d   :  { %1803 = vsyncpa [#allocation4], 1 }
 0x47e   :  { %1805 = vsyncpa [#allocation4 + $0x1], 1 }

</bundles_post_ra>
